<compile_context>
chip_gen: v7x
topology: tpu7x:2x2x1
jax: 0.10.0
libtpu: 0.0.40
codegen_flags: <defaults>
</compile_context>

<pallas_src>
import jax
import jax.numpy as jnp
from jax.experimental import pallas as pl
from jax.experimental.pallas import tpu as pltpu

# ---------------- model dims (small, consistent with the module) ----------------
INPUT_DIM = 20    # vocab size
EMB_DIM = 16
HIDDEN_DIM = 32
OUTPUT_DIM = 12   # max_fugue_len
N_LAYERS = 2
SEQ_LEN = 8
BATCH = 4

B_PAD = 8         # pad batch to a full 8-sublane vreg height
O_PAD = 128       # lane-dense output width (sliced back to OUTPUT_DIM in wrapper)
V_PAD = 32        # vocab padded to a sublane multiple for the one-hot matmul

assert 4 * HIDDEN_DIM == 128 == O_PAD  # gate width and padded output share 128 lanes

# row offsets inside the packed weight slab (all multiples of 8 -> tile aligned)
_R_EMBPROJ = 0                      # (V_PAD, 4H)  emb @ W_ih0.T, zero-padded rows
_R_WHH0 = _R_EMBPROJ + V_PAD        # (H, 4H)
_R_WIH1 = _R_WHH0 + HIDDEN_DIM      # (H, 4H)
_R_WHH1 = _R_WIH1 + HIDDEN_DIM      # (H, 4H)
_R_WOUT = _R_WHH1 + HIDDEN_DIM      # (H, O_PAD)
_SLAB_ROWS = _R_WOUT + HIDDEN_DIM   # 160


def lstm_fc_kernel(src_ref, w_ref, bias_ref, out_ref):
    """Single-program kernel: embed + 2-layer LSTM (unrolled over S) + fc_out.

    Shapes (all resident in VMEM as full-array blocks):
      src_ref  : (S*B_PAD, 1)       int32 token ids, time-major rows
      w_ref    : (160, 128)         bf16 packed weight slab (see _R_* offsets)
      bias_ref : (3, 128)           f32 rows: b0 (l0), b1 (l1), b_out (padded)
      out_ref  : (S*B_PAD, O_PAD)   f32 predictions, lane-dense per-step stores
    """
    H = HIDDEN_DIM
    B = B_PAD
    S = SEQ_LEN

    # static, tile-aligned slices of the single weight slab (bf16)
    emb_proj = w_ref[_R_EMBPROJ:_R_EMBPROJ + V_PAD, :]   # (V_PAD, 4H)
    whh0 = w_ref[_R_WHH0:_R_WHH0 + H, :]                 # (H, 4H)
    wih1 = w_ref[_R_WIH1:_R_WIH1 + H, :]                 # (H, 4H)
    whh1 = w_ref[_R_WHH1:_R_WHH1 + H, :]                 # (H, 4H)
    wout = w_ref[_R_WOUT:_R_WOUT + H, :]                 # (H, O_PAD)

    bias = bias_ref[...]
    b0 = bias[0:1, :]          # (1, 4H)  b_ih_l0 + b_hh_l0
    b1 = bias[1:2, :]          # (1, 4H)  b_ih_l1 + b_hh_l1
    bout = bias[2:3, :]        # (1, O_PAD)

    # Fused embedding gather + hoisted layer-0 input projection for ALL steps:
    # one-hot(src) @ (emb @ W_ih0.T).  Dropout on embeddings is identity (eval).
    ids = src_ref[...]                                                   # (S*B, 1)
    lane_iota = jax.lax.broadcasted_iota(jnp.int32, (S * B, V_PAD), 1)
    onehot = (lane_iota == ids).astype(jnp.bfloat16)                     # (S*B, Vp)
    xproj = jnp.dot(onehot, emb_proj,
                    preferred_element_type=jnp.float32) + b0             # (S*B, 4H) f32

    def gates_to_hc(gates, c_prev):
        # PyTorch gate order i, f, g, o.  Full-width sigmoid (EUP); tanh on g only.
        sg = jax.nn.sigmoid(gates)
        i = sg[:, 0:H]
        f = sg[:, H:2 * H]
        g = jnp.tanh(gates[:, 2 * H:3 * H])
        o = sg[:, 3 * H:4 * H]
        c_new = f * c_prev + i * g
        h_new = o * jnp.tanh(c_new)
        return h_new, c_new

    # Recurrent state lives in vregs (loop-carried), gate math in f32.
    h0 = jnp.zeros((B, H), jnp.float32)
    c0 = jnp.zeros((B, H), jnp.float32)
    h1 = jnp.zeros((B, H), jnp.float32)
    c1 = jnp.zeros((B, H), jnp.float32)

    for t in range(S):  # fully unrolled: S is tiny and static
        # layer-1 recurrent product depends only on PREVIOUS h1 -> issue first,
        # it overlaps the layer-0 matmul + gate chain below.
        g1_rec = jnp.dot(h1.astype(jnp.bfloat16), whh1,
                         preferred_element_type=jnp.float32)             # (B, 4H)

        # layer 0: only the recurrent matmul sits on the serial path
        g0 = xproj[t * B:(t + 1) * B, :] + jnp.dot(
            h0.astype(jnp.bfloat16), whh0, preferred_element_type=jnp.float32)
        h0, c0 = gates_to_hc(g0, c0)

        # layer 1 (inter-layer dropout is identity in eval mode)
        g1 = jnp.dot(h0.astype(jnp.bfloat16), wih1,
                     preferred_element_type=jnp.float32) + g1_rec + b1
        h1, c1 = gates_to_hc(g1, c1)

        # fc_out streamed per step: lane-dense (8,128) store using idle MXU/vst slack
        out_ref[t * B:(t + 1) * B, :] = jnp.dot(
            h1.astype(jnp.bfloat16), wout,
            preferred_element_type=jnp.float32) + bout


def pack_weights(params):
    """One-time weight packing (call once at init and cache the result).

    Folds the embedding table into the layer-0 input weights, transposes /
    pads everything, and packs it into a single lane-dense bf16 slab plus one
    small f32 bias array so the per-call wrapper does no weight-prep XLA ops.
    """
    H, O, V = HIDDEN_DIM, OUTPUT_DIM, INPUT_DIM

    emb_proj = params["emb"] @ params["w_ih_l0"].T                 # (V, 4H)
    emb_proj = jnp.pad(emb_proj, ((0, V_PAD - V), (0, 0)))         # (V_PAD, 4H)
    whh0 = params["w_hh_l0"].T                                     # (H, 4H)
    wih1 = params["w_ih_l1"].T                                     # (H, 4H)
    whh1 = params["w_hh_l1"].T                                     # (H, 4H)
    wout = jnp.pad(params["w_out"].T, ((0, 0), (0, O_PAD - O)))    # (H, O_PAD)

    w_slab = jnp.concatenate([emb_proj, whh0, wih1, whh1, wout],
                             axis=0).astype(jnp.bfloat16)          # (160, 128)
    assert w_slab.shape == (_SLAB_ROWS, 128)

    b0 = (params["b_ih_l0"] + params["b_hh_l0"]).reshape(1, 4 * H)
    b1 = (params["b_ih_l1"] + params["b_hh_l1"]).reshape(1, 4 * H)
    bout = jnp.pad(params["b_out"].reshape(1, O), ((0, 0), (0, O_PAD - O)))
    biases = jnp.concatenate([b0, b1, bout], axis=0).astype(jnp.float32)  # (3, 128)

    return {"w_slab": w_slab, "biases": biases}


def seq2seq_forward(src, packed):
    """src: (S, B) int32. packed: output of pack_weights. Returns (S, B, OUTPUT_DIM)."""
    S, B = src.shape
    # Only per-call prep: pad batch to 8 sublanes, flatten time-major.
    src_ids = jnp.pad(src.astype(jnp.int32),
                      ((0, 0), (0, B_PAD - B))).reshape(S * B_PAD, 1)

    vmem = pl.BlockSpec(memory_space=pltpu.MemorySpace.VMEM)
    out = pl.pallas_call(
        lstm_fc_kernel,
        out_shape=jax.ShapeDtypeStruct((S * B_PAD, O_PAD), jnp.float32),
        in_specs=[vmem, vmem, vmem],
        out_specs=vmem,
    )(src_ids, packed["w_slab"], packed["biases"])

    return out.reshape(S, B_PAD, O_PAD)[:, :B, :OUTPUT_DIM]


def init_params(key):
    """Deterministic init; shapes mirror nn.Embedding / nn.LSTM / nn.Linear."""
    E, H, O, V = EMB_DIM, HIDDEN_DIM, OUTPUT_DIM, INPUT_DIM
    ks = jax.random.split(key, 12)
    u = lambda k, shape, s: jax.random.uniform(k, shape, jnp.float32, -s, s)
    bound = 1.0 / jnp.sqrt(H)
    return {
        "emb":     jax.random.normal(ks[0], (V, E), jnp.float32),
        "w_ih_l0": u(ks[1], (4 * H, E), bound),
        "w_hh_l0": u(ks[2], (4 * H, H), bound),
        "b_ih_l0": u(ks[3], (4 * H,), bound),
        "b_hh_l0": u(ks[4], (4 * H,), bound),
        "w_ih_l1": u(ks[5], (4 * H, H), bound),
        "w_hh_l1": u(ks[6], (4 * H, H), bound),
        "b_ih_l1": u(ks[7], (4 * H,), bound),
        "b_hh_l1": u(ks[8], (4 * H,), bound),
        "w_out":   u(ks[9], (O, H), bound),
        "b_out":   u(ks[10], (O,), bound),
    }


def reference_forward(src, p):
    """Pure-JAX f32 reference (same math as torch eval-mode forward)."""
    H = HIDDEN_DIM
    emb = jnp.take(p["emb"], src, axis=0)  # (S, B, E)

    def cell(x, h, c, wih, whh, b):
        g = x @ wih.T + h @ whh.T + b
        i = jax.nn.sigmoid(g[:, 0:H])
        f = jax.nn.sigmoid(g[:, H:2 * H])
        gg = jnp.tanh(g[:, 2 * H:3 * H])
        o = jax.nn.sigmoid(g[:, 3 * H:4 * H])
        c = f * c + i * gg
        h = o * jnp.tanh(c)
        return h, c

    B = src.shape[1]
    h0 = c0 = h1 = c1 = jnp.zeros((B, H), jnp.float32)
    outs = []
    for t in range(src.shape[0]):
        h0, c0 = cell(emb[t], h0, c0, p["w_ih_l0"], p["w_hh_l0"],
                      p["b_ih_l0"] + p["b_hh_l0"])
        h1, c1 = cell(h0, h1, c1, p["w_ih_l1"], p["w_hh_l1"],
                      p["b_ih_l1"] + p["b_hh_l1"])
        outs.append(h1 @ p["w_out"].T + p["b_out"])
    return jnp.stack(outs, axis=0)


if __name__ == "__main__":
    key = jax.random.PRNGKey(0)
    k_param, k_src = jax.random.split(key)
    params = init_params(k_param)
    packed = pack_weights(params)   # one-time packing, cached across calls
    src = jax.random.randint(k_src, (SEQ_LEN, BATCH), 0, INPUT_DIM, jnp.int32)

    preds = seq2seq_forward(src, packed)
    preds = jax.block_until_ready(preds)

    ref = reference_forward(src, params)
    assert preds.shape == (SEQ_LEN, BATCH, OUTPUT_DIM)
    # bf16 matmul operands (f32 accumulation) compound a little rounding over
    # the 8-step recurrence -> looser tolerance than the all-f32 version.
    assert jnp.allclose(preds, ref, atol=3e-2, rtol=3e-2)

    print("KERNEL_OK")
</pallas_src>

<mosaic_0001>
module attributes {stable_mosaic.version = 11 : i64} {
  func.func @lstm_fc_kernel(%arg0: memref<64x1xi32, #tpu.memory_space<vmem>>, %arg1: memref<160x128xbf16, #tpu.memory_space<vmem>>, %arg2: memref<3x128xf32, #tpu.memory_space<vmem>>, %arg3: memref<64x128xf32, #tpu.memory_space<vmem>>) attributes {dimension_semantics = [], scalar_prefetch = 0 : i64, scratch_operands = 0 : i64, tpu.core_type = #tpu.core_type<tc>} {
    %c0 = arith.constant 0 : index
    %c0_0 = arith.constant 0 : index
    %0 = vector.load %arg1[%c0, %c0_0] : memref<160x128xbf16, #tpu.memory_space<vmem>>, vector<32x128xbf16>
    %c32 = arith.constant 32 : index
    %c0_1 = arith.constant 0 : index
    %1 = vector.load %arg1[%c32, %c0_1] : memref<160x128xbf16, #tpu.memory_space<vmem>>, vector<32x128xbf16>
    %c64 = arith.constant 64 : index
    %c0_2 = arith.constant 0 : index
    %2 = vector.load %arg1[%c64, %c0_2] : memref<160x128xbf16, #tpu.memory_space<vmem>>, vector<32x128xbf16>
    %c96 = arith.constant 96 : index
    %c0_3 = arith.constant 0 : index
    %3 = vector.load %arg1[%c96, %c0_3] : memref<160x128xbf16, #tpu.memory_space<vmem>>, vector<32x128xbf16>
    %c128 = arith.constant 128 : index
    %c0_4 = arith.constant 0 : index
    %4 = vector.load %arg1[%c128, %c0_4] : memref<160x128xbf16, #tpu.memory_space<vmem>>, vector<32x128xbf16>
    %c0_5 = arith.constant 0 : index
    %c0_6 = arith.constant 0 : index
    %5 = vector.load %arg2[%c0_5, %c0_6] : memref<3x128xf32, #tpu.memory_space<vmem>>, vector<3x128xf32>
    %6 = vector.extract_strided_slice %5 {offsets = [0, 0], sizes = [1, 128], strides = [1, 1]} : vector<3x128xf32> to vector<1x128xf32>
    %7 = vector.extract_strided_slice %5 {offsets = [1, 0], sizes = [1, 128], strides = [1, 1]} : vector<3x128xf32> to vector<1x128xf32>
    %8 = vector.extract_strided_slice %5 {offsets = [2, 0], sizes = [1, 128], strides = [1, 1]} : vector<3x128xf32> to vector<1x128xf32>
    %c0_7 = arith.constant 0 : index
    %c0_8 = arith.constant 0 : index
    %9 = vector.load %arg0[%c0_7, %c0_8] : memref<64x1xi32, #tpu.memory_space<vmem>>, vector<64x1xi32>
    %10 = tpu.iota {dimensions = array<i32: 1>} : vector<64x32xi32>
    %11 = vector.broadcast %9 : vector<64x1xi32> to vector<64x32xi32>
    %12 = arith.cmpi eq, %10, %11 : vector<64x32xi32>
    %13 = arith.extui %12 : vector<64x32xi1> to vector<64x32xi32>
    %14 = arith.sitofp %13 : vector<64x32xi32> to vector<64x32xf32>
    %15 = arith.truncf %14 : vector<64x32xf32> to vector<64x32xbf16>
    %cst = arith.constant dense<0.000000e+00> : vector<64x128xf32>
    %16 = tpu.matmul %15, %0, %cst {dimension_numbers = #tpu.dot_dimension_numbers<[1], [0], [0], [1], [0, 0, 1, 1], [], []>} : vector<64x32xbf16>, vector<32x128xbf16>, vector<64x128xf32> -> vector<64x128xf32>
    %17 = vector.broadcast %6 : vector<1x128xf32> to vector<64x128xf32>
    %18 = arith.addf %16, %17 : vector<64x128xf32>
    %cst_9 = arith.constant 0.000000e+00 : f32
    %19 = vector.broadcast %cst_9 : f32 to vector<8x32xf32>
    %cst_10 = arith.constant 0.000000e+00 : f32
    %20 = vector.broadcast %cst_10 : f32 to vector<8x32xf32>
    %cst_11 = arith.constant 0.000000e+00 : f32
    %21 = vector.broadcast %cst_11 : f32 to vector<8x32xf32>
    %cst_12 = arith.constant 0.000000e+00 : f32
    %22 = vector.broadcast %cst_12 : f32 to vector<8x32xf32>
    %23 = arith.truncf %21 : vector<8x32xf32> to vector<8x32xbf16>
    %cst_13 = arith.constant dense<0.000000e+00> : vector<8x128xf32>
    %24 = tpu.matmul %23, %3, %cst_13 {dimension_numbers = #tpu.dot_dimension_numbers<[1], [0], [0], [1], [0, 0, 1, 1], [], []>} : vector<8x32xbf16>, vector<32x128xbf16>, vector<8x128xf32> -> vector<8x128xf32>
    %25 = vector.extract_strided_slice %18 {offsets = [0, 0], sizes = [8, 128], strides = [1, 1]} : vector<64x128xf32> to vector<8x128xf32>
    %26 = arith.truncf %19 : vector<8x32xf32> to vector<8x32xbf16>
    %cst_14 = arith.constant dense<0.000000e+00> : vector<8x128xf32>
    %27 = tpu.matmul %26, %1, %cst_14 {dimension_numbers = #tpu.dot_dimension_numbers<[1], [0], [0], [1], [0, 0, 1, 1], [], []>} : vector<8x32xbf16>, vector<32x128xbf16>, vector<8x128xf32> -> vector<8x128xf32>
    %28 = arith.addf %25, %27 : vector<8x128xf32>
    %29 = arith.negf %28 : vector<8x128xf32>
    %30 = math.exp %29 : vector<8x128xf32>
    %cst_15 = arith.constant 1.000000e+00 : f32
    %31 = vector.broadcast %cst_15 : f32 to vector<8x128xf32>
    %32 = arith.addf %31, %30 : vector<8x128xf32>
    %33 = arith.divf %31, %32 : vector<8x128xf32>
    %34 = vector.extract_strided_slice %33 {offsets = [0, 0], sizes = [8, 32], strides = [1, 1]} : vector<8x128xf32> to vector<8x32xf32>
    %35 = vector.extract_strided_slice %33 {offsets = [0, 32], sizes = [8, 32], strides = [1, 1]} : vector<8x128xf32> to vector<8x32xf32>
    %36 = vector.extract_strided_slice %28 {offsets = [0, 64], sizes = [8, 32], strides = [1, 1]} : vector<8x128xf32> to vector<8x32xf32>
    %37 = math.tanh %36 : vector<8x32xf32>
    %38 = vector.extract_strided_slice %33 {offsets = [0, 96], sizes = [8, 32], strides = [1, 1]} : vector<8x128xf32> to vector<8x32xf32>
    %39 = arith.mulf %35, %20 : vector<8x32xf32>
    %40 = arith.mulf %34, %37 : vector<8x32xf32>
    %41 = arith.addf %39, %40 : vector<8x32xf32>
    %42 = math.tanh %41 : vector<8x32xf32>
    %43 = arith.mulf %38, %42 : vector<8x32xf32>
    %44 = arith.truncf %43 : vector<8x32xf32> to vector<8x32xbf16>
    %cst_16 = arith.constant dense<0.000000e+00> : vector<8x128xf32>
    %45 = tpu.matmul %44, %2, %cst_16 {dimension_numbers = #tpu.dot_dimension_numbers<[1], [0], [0], [1], [0, 0, 1, 1], [], []>} : vector<8x32xbf16>, vector<32x128xbf16>, vector<8x128xf32> -> vector<8x128xf32>
    %46 = arith.addf %45, %24 : vector<8x128xf32>
    %47 = vector.broadcast %7 : vector<1x128xf32> to vector<8x128xf32>
    %48 = arith.addf %46, %47 : vector<8x128xf32>
    %49 = arith.negf %48 : vector<8x128xf32>
    %50 = math.exp %49 : vector<8x128xf32>
    %cst_17 = arith.constant 1.000000e+00 : f32
    %51 = vector.broadcast %cst_17 : f32 to vector<8x128xf32>
    %52 = arith.addf %51, %50 : vector<8x128xf32>
    %53 = arith.divf %51, %52 : vector<8x128xf32>
    %54 = vector.extract_strided_slice %53 {offsets = [0, 0], sizes = [8, 32], strides = [1, 1]} : vector<8x128xf32> to vector<8x32xf32>
    %55 = vector.extract_strided_slice %53 {offsets = [0, 32], sizes = [8, 32], strides = [1, 1]} : vector<8x128xf32> to vector<8x32xf32>
    %56 = vector.extract_strided_slice %48 {offsets = [0, 64], sizes = [8, 32], strides = [1, 1]} : vector<8x128xf32> to vector<8x32xf32>
    %57 = math.tanh %56 : vector<8x32xf32>
    %58 = vector.extract_strided_slice %53 {offsets = [0, 96], sizes = [8, 32], strides = [1, 1]} : vector<8x128xf32> to vector<8x32xf32>
    %59 = arith.mulf %55, %22 : vector<8x32xf32>
    %60 = arith.mulf %54, %57 : vector<8x32xf32>
    %61 = arith.addf %59, %60 : vector<8x32xf32>
    %62 = math.tanh %61 : vector<8x32xf32>
    %63 = arith.mulf %58, %62 : vector<8x32xf32>
    %64 = arith.truncf %63 : vector<8x32xf32> to vector<8x32xbf16>
    %cst_18 = arith.constant dense<0.000000e+00> : vector<8x128xf32>
    %65 = tpu.matmul %64, %4, %cst_18 {dimension_numbers = #tpu.dot_dimension_numbers<[1], [0], [0], [1], [0, 0, 1, 1], [], []>} : vector<8x32xbf16>, vector<32x128xbf16>, vector<8x128xf32> -> vector<8x128xf32>
    %66 = vector.broadcast %8 : vector<1x128xf32> to vector<8x128xf32>
    %67 = arith.addf %65, %66 : vector<8x128xf32>
    %c0_19 = arith.constant 0 : index
    %c0_20 = arith.constant 0 : index
    %68 = vector.load %arg3[%c0_19, %c0_20] : memref<64x128xf32, #tpu.memory_space<vmem>>, vector<8x128xf32>
    tpu.vector_store %arg3[%c0_19, %c0_20], %67 {strides = array<i32>} : memref<64x128xf32, #tpu.memory_space<vmem>>, vector<8x128xf32>,
    %69 = arith.truncf %63 : vector<8x32xf32> to vector<8x32xbf16>
    %cst_21 = arith.constant dense<0.000000e+00> : vector<8x128xf32>
    %70 = tpu.matmul %69, %3, %cst_21 {dimension_numbers = #tpu.dot_dimension_numbers<[1], [0], [0], [1], [0, 0, 1, 1], [], []>} : vector<8x32xbf16>, vector<32x128xbf16>, vector<8x128xf32> -> vector<8x128xf32>
    %71 = vector.extract_strided_slice %18 {offsets = [8, 0], sizes = [8, 128], strides = [1, 1]} : vector<64x128xf32> to vector<8x128xf32>
    %72 = arith.truncf %43 : vector<8x32xf32> to vector<8x32xbf16>
    %cst_22 = arith.constant dense<0.000000e+00> : vector<8x128xf32>
    %73 = tpu.matmul %72, %1, %cst_22 {dimension_numbers = #tpu.dot_dimension_numbers<[1], [0], [0], [1], [0, 0, 1, 1], [], []>} : vector<8x32xbf16>, vector<32x128xbf16>, vector<8x128xf32> -> vector<8x128xf32>
    %74 = arith.addf %71, %73 : vector<8x128xf32>
    %75 = arith.negf %74 : vector<8x128xf32>
    %76 = math.exp %75 : vector<8x128xf32>
    %cst_23 = arith.constant 1.000000e+00 : f32
    %77 = vector.broadcast %cst_23 : f32 to vector<8x128xf32>
    %78 = arith.addf %77, %76 : vector<8x128xf32>
    %79 = arith.divf %77, %78 : vector<8x128xf32>
    %80 = vector.extract_strided_slice %79 {offsets = [0, 0], sizes = [8, 32], strides = [1, 1]} : vector<8x128xf32> to vector<8x32xf32>
    %81 = vector.extract_strided_slice %79 {offsets = [0, 32], sizes = [8, 32], strides = [1, 1]} : vector<8x128xf32> to vector<8x32xf32>
    %82 = vector.extract_strided_slice %74 {offsets = [0, 64], sizes = [8, 32], strides = [1, 1]} : vector<8x128xf32> to vector<8x32xf32>
    %83 = math.tanh %82 : vector<8x32xf32>
    %84 = vector.extract_strided_slice %79 {offsets = [0, 96], sizes = [8, 32], strides = [1, 1]} : vector<8x128xf32> to vector<8x32xf32>
    %85 = arith.mulf %81, %41 : vector<8x32xf32>
    %86 = arith.mulf %80, %83 : vector<8x32xf32>
    %87 = arith.addf %85, %86 : vector<8x32xf32>
    %88 = math.tanh %87 : vector<8x32xf32>
    %89 = arith.mulf %84, %88 : vector<8x32xf32>
    %90 = arith.truncf %89 : vector<8x32xf32> to vector<8x32xbf16>
    %cst_24 = arith.constant dense<0.000000e+00> : vector<8x128xf32>
    %91 = tpu.matmul %90, %2, %cst_24 {dimension_numbers = #tpu.dot_dimension_numbers<[1], [0], [0], [1], [0, 0, 1, 1], [], []>} : vector<8x32xbf16>, vector<32x128xbf16>, vector<8x128xf32> -> vector<8x128xf32>
    %92 = arith.addf %91, %70 : vector<8x128xf32>
    %93 = vector.broadcast %7 : vector<1x128xf32> to vector<8x128xf32>
    %94 = arith.addf %92, %93 : vector<8x128xf32>
    %95 = arith.negf %94 : vector<8x128xf32>
    %96 = math.exp %95 : vector<8x128xf32>
    %cst_25 = arith.constant 1.000000e+00 : f32
    %97 = vector.broadcast %cst_25 : f32 to vector<8x128xf32>
    %98 = arith.addf %97, %96 : vector<8x128xf32>
    %99 = arith.divf %97, %98 : vector<8x128xf32>
    %100 = vector.extract_strided_slice %99 {offsets = [0, 0], sizes = [8, 32], strides = [1, 1]} : vector<8x128xf32> to vector<8x32xf32>
    %101 = vector.extract_strided_slice %99 {offsets = [0, 32], sizes = [8, 32], strides = [1, 1]} : vector<8x128xf32> to vector<8x32xf32>
    %102 = vector.extract_strided_slice %94 {offsets = [0, 64], sizes = [8, 32], strides = [1, 1]} : vector<8x128xf32> to vector<8x32xf32>
    %103 = math.tanh %102 : vector<8x32xf32>
    %104 = vector.extract_strided_slice %99 {offsets = [0, 96], sizes = [8, 32], strides = [1, 1]} : vector<8x128xf32> to vector<8x32xf32>
    %105 = arith.mulf %101, %61 : vector<8x32xf32>
    %106 = arith.mulf %100, %103 : vector<8x32xf32>
    %107 = arith.addf %105, %106 : vector<8x32xf32>
    %108 = math.tanh %107 : vector<8x32xf32>
    %109 = arith.mulf %104, %108 : vector<8x32xf32>
    %110 = arith.truncf %109 : vector<8x32xf32> to vector<8x32xbf16>
    %cst_26 = arith.constant dense<0.000000e+00> : vector<8x128xf32>
    %111 = tpu.matmul %110, %4, %cst_26 {dimension_numbers = #tpu.dot_dimension_numbers<[1], [0], [0], [1], [0, 0, 1, 1], [], []>} : vector<8x32xbf16>, vector<32x128xbf16>, vector<8x128xf32> -> vector<8x128xf32>
    %112 = vector.broadcast %8 : vector<1x128xf32> to vector<8x128xf32>
    %113 = arith.addf %111, %112 : vector<8x128xf32>
    %c8 = arith.constant 8 : index
    %c0_27 = arith.constant 0 : index
    %114 = vector.load %arg3[%c8, %c0_27] : memref<64x128xf32, #tpu.memory_space<vmem>>, vector<8x128xf32>
    tpu.vector_store %arg3[%c8, %c0_27], %113 {strides = array<i32>} : memref<64x128xf32, #tpu.memory_space<vmem>>, vector<8x128xf32>,
    %115 = arith.truncf %109 : vector<8x32xf32> to vector<8x32xbf16>
    %cst_28 = arith.constant dense<0.000000e+00> : vector<8x128xf32>
    %116 = tpu.matmul %115, %3, %cst_28 {dimension_numbers = #tpu.dot_dimension_numbers<[1], [0], [0], [1], [0, 0, 1, 1], [], []>} : vector<8x32xbf16>, vector<32x128xbf16>, vector<8x128xf32> -> vector<8x128xf32>
    %117 = vector.extract_strided_slice %18 {offsets = [16, 0], sizes = [8, 128], strides = [1, 1]} : vector<64x128xf32> to vector<8x128xf32>
    %118 = arith.truncf %89 : vector<8x32xf32> to vector<8x32xbf16>
    %cst_29 = arith.constant dense<0.000000e+00> : vector<8x128xf32>
    %119 = tpu.matmul %118, %1, %cst_29 {dimension_numbers = #tpu.dot_dimension_numbers<[1], [0], [0], [1], [0, 0, 1, 1], [], []>} : vector<8x32xbf16>, vector<32x128xbf16>, vector<8x128xf32> -> vector<8x128xf32>
    %120 = arith.addf %117, %119 : vector<8x128xf32>
    %121 = arith.negf %120 : vector<8x128xf32>
    %122 = math.exp %121 : vector<8x128xf32>
    %cst_30 = arith.constant 1.000000e+00 : f32
    %123 = vector.broadcast %cst_30 : f32 to vector<8x128xf32>
    %124 = arith.addf %123, %122 : vector<8x128xf32>
    %125 = arith.divf %123, %124 : vector<8x128xf32>
    %126 = vector.extract_strided_slice %125 {offsets = [0, 0], sizes = [8, 32], strides = [1, 1]} : vector<8x128xf32> to vector<8x32xf32>
    %127 = vector.extract_strided_slice %125 {offsets = [0, 32], sizes = [8, 32], strides = [1, 1]} : vector<8x128xf32> to vector<8x32xf32>
    %128 = vector.extract_strided_slice %120 {offsets = [0, 64], sizes = [8, 32], strides = [1, 1]} : vector<8x128xf32> to vector<8x32xf32>
    %129 = math.tanh %128 : vector<8x32xf32>
    %130 = vector.extract_strided_slice %125 {offsets = [0, 96], sizes = [8, 32], strides = [1, 1]} : vector<8x128xf32> to vector<8x32xf32>
    %131 = arith.mulf %127, %87 : vector<8x32xf32>
    %132 = arith.mulf %126, %129 : vector<8x32xf32>
    %133 = arith.addf %131, %132 : vector<8x32xf32>
    %134 = math.tanh %133 : vector<8x32xf32>
    %135 = arith.mulf %130, %134 : vector<8x32xf32>
    %136 = arith.truncf %135 : vector<8x32xf32> to vector<8x32xbf16>
    %cst_31 = arith.constant dense<0.000000e+00> : vector<8x128xf32>
    %137 = tpu.matmul %136, %2, %cst_31 {dimension_numbers = #tpu.dot_dimension_numbers<[1], [0], [0], [1], [0, 0, 1, 1], [], []>} : vector<8x32xbf16>, vector<32x128xbf16>, vector<8x128xf32> -> vector<8x128xf32>
    %138 = arith.addf %137, %116 : vector<8x128xf32>
    %139 = vector.broadcast %7 : vector<1x128xf32> to vector<8x128xf32>
    %140 = arith.addf %138, %139 : vector<8x128xf32>
    %141 = arith.negf %140 : vector<8x128xf32>
    %142 = math.exp %141 : vector<8x128xf32>
    %cst_32 = arith.constant 1.000000e+00 : f32
    %143 = vector.broadcast %cst_32 : f32 to vector<8x128xf32>
    %144 = arith.addf %143, %142 : vector<8x128xf32>
    %145 = arith.divf %143, %144 : vector<8x128xf32>
    %146 = vector.extract_strided_slice %145 {offsets = [0, 0], sizes = [8, 32], strides = [1, 1]} : vector<8x128xf32> to vector<8x32xf32>
    %147 = vector.extract_strided_slice %145 {offsets = [0, 32], sizes = [8, 32], strides = [1, 1]} : vector<8x128xf32> to vector<8x32xf32>
    %148 = vector.extract_strided_slice %140 {offsets = [0, 64], sizes = [8, 32], strides = [1, 1]} : vector<8x128xf32> to vector<8x32xf32>
    %149 = math.tanh %148 : vector<8x32xf32>
    %150 = vector.extract_strided_slice %145 {offsets = [0, 96], sizes = [8, 32], strides = [1, 1]} : vector<8x128xf32> to vector<8x32xf32>
    %151 = arith.mulf %147, %107 : vector<8x32xf32>
    %152 = arith.mulf %146, %149 : vector<8x32xf32>
    %153 = arith.addf %151, %152 : vector<8x32xf32>
    %154 = math.tanh %153 : vector<8x32xf32>
    %155 = arith.mulf %150, %154 : vector<8x32xf32>
    %156 = arith.truncf %155 : vector<8x32xf32> to vector<8x32xbf16>
    %cst_33 = arith.constant dense<0.000000e+00> : vector<8x128xf32>
    %157 = tpu.matmul %156, %4, %cst_33 {dimension_numbers = #tpu.dot_dimension_numbers<[1], [0], [0], [1], [0, 0, 1, 1], [], []>} : vector<8x32xbf16>, vector<32x128xbf16>, vector<8x128xf32> -> vector<8x128xf32>
    %158 = vector.broadcast %8 : vector<1x128xf32> to vector<8x128xf32>
    %159 = arith.addf %157, %158 : vector<8x128xf32>
    %c16 = arith.constant 16 : index
    %c0_34 = arith.constant 0 : index
    %160 = vector.load %arg3[%c16, %c0_34] : memref<64x128xf32, #tpu.memory_space<vmem>>, vector<8x128xf32>
    tpu.vector_store %arg3[%c16, %c0_34], %159 {strides = array<i32>} : memref<64x128xf32, #tpu.memory_space<vmem>>, vector<8x128xf32>,
    %161 = arith.truncf %155 : vector<8x32xf32> to vector<8x32xbf16>
    %cst_35 = arith.constant dense<0.000000e+00> : vector<8x128xf32>
    %162 = tpu.matmul %161, %3, %cst_35 {dimension_numbers = #tpu.dot_dimension_numbers<[1], [0], [0], [1], [0, 0, 1, 1], [], []>} : vector<8x32xbf16>, vector<32x128xbf16>, vector<8x128xf32> -> vector<8x128xf32>
    %163 = vector.extract_strided_slice %18 {offsets = [24, 0], sizes = [8, 128], strides = [1, 1]} : vector<64x128xf32> to vector<8x128xf32>
    %164 = arith.truncf %135 : vector<8x32xf32> to vector<8x32xbf16>
    %cst_36 = arith.constant dense<0.000000e+00> : vector<8x128xf32>
    %165 = tpu.matmul %164, %1, %cst_36 {dimension_numbers = #tpu.dot_dimension_numbers<[1], [0], [0], [1], [0, 0, 1, 1], [], []>} : vector<8x32xbf16>, vector<32x128xbf16>, vector<8x128xf32> -> vector<8x128xf32>
    %166 = arith.addf %163, %165 : vector<8x128xf32>
    %167 = arith.negf %166 : vector<8x128xf32>
    %168 = math.exp %167 : vector<8x128xf32>
    %cst_37 = arith.constant 1.000000e+00 : f32
    %169 = vector.broadcast %cst_37 : f32 to vector<8x128xf32>
    %170 = arith.addf %169, %168 : vector<8x128xf32>
    %171 = arith.divf %169, %170 : vector<8x128xf32>
    %172 = vector.extract_strided_slice %171 {offsets = [0, 0], sizes = [8, 32], strides = [1, 1]} : vector<8x128xf32> to vector<8x32xf32>
    %173 = vector.extract_strided_slice %171 {offsets = [0, 32], sizes = [8, 32], strides = [1, 1]} : vector<8x128xf32> to vector<8x32xf32>
    %174 = vector.extract_strided_slice %166 {offsets = [0, 64], sizes = [8, 32], strides = [1, 1]} : vector<8x128xf32> to vector<8x32xf32>
    %175 = math.tanh %174 : vector<8x32xf32>
    %176 = vector.extract_strided_slice %171 {offsets = [0, 96], sizes = [8, 32], strides = [1, 1]} : vector<8x128xf32> to vector<8x32xf32>
    %177 = arith.mulf %173, %133 : vector<8x32xf32>
    %178 = arith.mulf %172, %175 : vector<8x32xf32>
    %179 = arith.addf %177, %178 : vector<8x32xf32>
    %180 = math.tanh %179 : vector<8x32xf32>
    %181 = arith.mulf %176, %180 : vector<8x32xf32>
    %182 = arith.truncf %181 : vector<8x32xf32> to vector<8x32xbf16>
    %cst_38 = arith.constant dense<0.000000e+00> : vector<8x128xf32>
    %183 = tpu.matmul %182, %2, %cst_38 {dimension_numbers = #tpu.dot_dimension_numbers<[1], [0], [0], [1], [0, 0, 1, 1], [], []>} : vector<8x32xbf16>, vector<32x128xbf16>, vector<8x128xf32> -> vector<8x128xf32>
    %184 = arith.addf %183, %162 : vector<8x128xf32>
    %185 = vector.broadcast %7 : vector<1x128xf32> to vector<8x128xf32>
    %186 = arith.addf %184, %185 : vector<8x128xf32>
    %187 = arith.negf %186 : vector<8x128xf32>
    %188 = math.exp %187 : vector<8x128xf32>
    %cst_39 = arith.constant 1.000000e+00 : f32
    %189 = vector.broadcast %cst_39 : f32 to vector<8x128xf32>
    %190 = arith.addf %189, %188 : vector<8x128xf32>
    %191 = arith.divf %189, %190 : vector<8x128xf32>
    %192 = vector.extract_strided_slice %191 {offsets = [0, 0], sizes = [8, 32], strides = [1, 1]} : vector<8x128xf32> to vector<8x32xf32>
    %193 = vector.extract_strided_slice %191 {offsets = [0, 32], sizes = [8, 32], strides = [1, 1]} : vector<8x128xf32> to vector<8x32xf32>
    %194 = vector.extract_strided_slice %186 {offsets = [0, 64], sizes = [8, 32], strides = [1, 1]} : vector<8x128xf32> to vector<8x32xf32>
    %195 = math.tanh %194 : vector<8x32xf32>
    %196 = vector.extract_strided_slice %191 {offsets = [0, 96], sizes = [8, 32], strides = [1, 1]} : vector<8x128xf32> to vector<8x32xf32>
    %197 = arith.mulf %193, %153 : vector<8x32xf32>
    %198 = arith.mulf %192, %195 : vector<8x32xf32>
    %199 = arith.addf %197, %198 : vector<8x32xf32>
    %200 = math.tanh %199 : vector<8x32xf32>
    %201 = arith.mulf %196, %200 : vector<8x32xf32>
    %202 = arith.truncf %201 : vector<8x32xf32> to vector<8x32xbf16>
    %cst_40 = arith.constant dense<0.000000e+00> : vector<8x128xf32>
    %203 = tpu.matmul %202, %4, %cst_40 {dimension_numbers = #tpu.dot_dimension_numbers<[1], [0], [0], [1], [0, 0, 1, 1], [], []>} : vector<8x32xbf16>, vector<32x128xbf16>, vector<8x128xf32> -> vector<8x128xf32>
    %204 = vector.broadcast %8 : vector<1x128xf32> to vector<8x128xf32>
    %205 = arith.addf %203, %204 : vector<8x128xf32>
    %c24 = arith.constant 24 : index
    %c0_41 = arith.constant 0 : index
    %206 = vector.load %arg3[%c24, %c0_41] : memref<64x128xf32, #tpu.memory_space<vmem>>, vector<8x128xf32>
    tpu.vector_store %arg3[%c24, %c0_41], %205 {strides = array<i32>} : memref<64x128xf32, #tpu.memory_space<vmem>>, vector<8x128xf32>,
    %207 = arith.truncf %201 : vector<8x32xf32> to vector<8x32xbf16>
    %cst_42 = arith.constant dense<0.000000e+00> : vector<8x128xf32>
    %208 = tpu.matmul %207, %3, %cst_42 {dimension_numbers = #tpu.dot_dimension_numbers<[1], [0], [0], [1], [0, 0, 1, 1], [], []>} : vector<8x32xbf16>, vector<32x128xbf16>, vector<8x128xf32> -> vector<8x128xf32>
    %209 = vector.extract_strided_slice %18 {offsets = [32, 0], sizes = [8, 128], strides = [1, 1]} : vector<64x128xf32> to vector<8x128xf32>
    %210 = arith.truncf %181 : vector<8x32xf32> to vector<8x32xbf16>
    %cst_43 = arith.constant dense<0.000000e+00> : vector<8x128xf32>
    %211 = tpu.matmul %210, %1, %cst_43 {dimension_numbers = #tpu.dot_dimension_numbers<[1], [0], [0], [1], [0, 0, 1, 1], [], []>} : vector<8x32xbf16>, vector<32x128xbf16>, vector<8x128xf32> -> vector<8x128xf32>
    %212 = arith.addf %209, %211 : vector<8x128xf32>
    %213 = arith.negf %212 : vector<8x128xf32>
    %214 = math.exp %213 : vector<8x128xf32>
    %cst_44 = arith.constant 1.000000e+00 : f32
    %215 = vector.broadcast %cst_44 : f32 to vector<8x128xf32>
    %216 = arith.addf %215, %214 : vector<8x128xf32>
    %217 = arith.divf %215, %216 : vector<8x128xf32>
    %218 = vector.extract_strided_slice %217 {offsets = [0, 0], sizes = [8, 32], strides = [1, 1]} : vector<8x128xf32> to vector<8x32xf32>
    %219 = vector.extract_strided_slice %217 {offsets = [0, 32], sizes = [8, 32], strides = [1, 1]} : vector<8x128xf32> to vector<8x32xf32>
    %220 = vector.extract_strided_slice %212 {offsets = [0, 64], sizes = [8, 32], strides = [1, 1]} : vector<8x128xf32> to vector<8x32xf32>
    %221 = math.tanh %220 : vector<8x32xf32>
    %222 = vector.extract_strided_slice %217 {offsets = [0, 96], sizes = [8, 32], strides = [1, 1]} : vector<8x128xf32> to vector<8x32xf32>
    %223 = arith.mulf %219, %179 : vector<8x32xf32>
    %224 = arith.mulf %218, %221 : vector<8x32xf32>
    %225 = arith.addf %223, %224 : vector<8x32xf32>
    %226 = math.tanh %225 : vector<8x32xf32>
    %227 = arith.mulf %222, %226 : vector<8x32xf32>
    %228 = arith.truncf %227 : vector<8x32xf32> to vector<8x32xbf16>
    %cst_45 = arith.constant dense<0.000000e+00> : vector<8x128xf32>
    %229 = tpu.matmul %228, %2, %cst_45 {dimension_numbers = #tpu.dot_dimension_numbers<[1], [0], [0], [1], [0, 0, 1, 1], [], []>} : vector<8x32xbf16>, vector<32x128xbf16>, vector<8x128xf32> -> vector<8x128xf32>
    %230 = arith.addf %229, %208 : vector<8x128xf32>
    %231 = vector.broadcast %7 : vector<1x128xf32> to vector<8x128xf32>
    %232 = arith.addf %230, %231 : vector<8x128xf32>
    %233 = arith.negf %232 : vector<8x128xf32>
    %234 = math.exp %233 : vector<8x128xf32>
    %cst_46 = arith.constant 1.000000e+00 : f32
    %235 = vector.broadcast %cst_46 : f32 to vector<8x128xf32>
    %236 = arith.addf %235, %234 : vector<8x128xf32>
    %237 = arith.divf %235, %236 : vector<8x128xf32>
    %238 = vector.extract_strided_slice %237 {offsets = [0, 0], sizes = [8, 32], strides = [1, 1]} : vector<8x128xf32> to vector<8x32xf32>
    %239 = vector.extract_strided_slice %237 {offsets = [0, 32], sizes = [8, 32], strides = [1, 1]} : vector<8x128xf32> to vector<8x32xf32>
    %240 = vector.extract_strided_slice %232 {offsets = [0, 64], sizes = [8, 32], strides = [1, 1]} : vector<8x128xf32> to vector<8x32xf32>
    %241 = math.tanh %240 : vector<8x32xf32>
    %242 = vector.extract_strided_slice %237 {offsets = [0, 96], sizes = [8, 32], strides = [1, 1]} : vector<8x128xf32> to vector<8x32xf32>
    %243 = arith.mulf %239, %199 : vector<8x32xf32>
    %244 = arith.mulf %238, %241 : vector<8x32xf32>
    %245 = arith.addf %243, %244 : vector<8x32xf32>
    %246 = math.tanh %245 : vector<8x32xf32>
    %247 = arith.mulf %242, %246 : vector<8x32xf32>
    %248 = arith.truncf %247 : vector<8x32xf32> to vector<8x32xbf16>
    %cst_47 = arith.constant dense<0.000000e+00> : vector<8x128xf32>
    %249 = tpu.matmul %248, %4, %cst_47 {dimension_numbers = #tpu.dot_dimension_numbers<[1], [0], [0], [1], [0, 0, 1, 1], [], []>} : vector<8x32xbf16>, vector<32x128xbf16>, vector<8x128xf32> -> vector<8x128xf32>
    %250 = vector.broadcast %8 : vector<1x128xf32> to vector<8x128xf32>
    %251 = arith.addf %249, %250 : vector<8x128xf32>
    %c32_48 = arith.constant 32 : index
    %c0_49 = arith.constant 0 : index
    %252 = vector.load %arg3[%c32_48, %c0_49] : memref<64x128xf32, #tpu.memory_space<vmem>>, vector<8x128xf32>
    tpu.vector_store %arg3[%c32_48, %c0_49], %251 {strides = array<i32>} : memref<64x128xf32, #tpu.memory_space<vmem>>, vector<8x128xf32>,
    %253 = arith.truncf %247 : vector<8x32xf32> to vector<8x32xbf16>
    %cst_50 = arith.constant dense<0.000000e+00> : vector<8x128xf32>
    %254 = tpu.matmul %253, %3, %cst_50 {dimension_numbers = #tpu.dot_dimension_numbers<[1], [0], [0], [1], [0, 0, 1, 1], [], []>} : vector<8x32xbf16>, vector<32x128xbf16>, vector<8x128xf32> -> vector<8x128xf32>
    %255 = vector.extract_strided_slice %18 {offsets = [40, 0], sizes = [8, 128], strides = [1, 1]} : vector<64x128xf32> to vector<8x128xf32>
    %256 = arith.truncf %227 : vector<8x32xf32> to vector<8x32xbf16>
    %cst_51 = arith.constant dense<0.000000e+00> : vector<8x128xf32>
    %257 = tpu.matmul %256, %1, %cst_51 {dimension_numbers = #tpu.dot_dimension_numbers<[1], [0], [0], [1], [0, 0, 1, 1], [], []>} : vector<8x32xbf16>, vector<32x128xbf16>, vector<8x128xf32> -> vector<8x128xf32>
    %258 = arith.addf %255, %257 : vector<8x128xf32>
    %259 = arith.negf %258 : vector<8x128xf32>
    %260 = math.exp %259 : vector<8x128xf32>
    %cst_52 = arith.constant 1.000000e+00 : f32
    %261 = vector.broadcast %cst_52 : f32 to vector<8x128xf32>
    %262 = arith.addf %261, %260 : vector<8x128xf32>
    %263 = arith.divf %261, %262 : vector<8x128xf32>
    %264 = vector.extract_strided_slice %263 {offsets = [0, 0], sizes = [8, 32], strides = [1, 1]} : vector<8x128xf32> to vector<8x32xf32>
    %265 = vector.extract_strided_slice %263 {offsets = [0, 32], sizes = [8, 32], strides = [1, 1]} : vector<8x128xf32> to vector<8x32xf32>
    %266 = vector.extract_strided_slice %258 {offsets = [0, 64], sizes = [8, 32], strides = [1, 1]} : vector<8x128xf32> to vector<8x32xf32>
    %267 = math.tanh %266 : vector<8x32xf32>
    %268 = vector.extract_strided_slice %263 {offsets = [0, 96], sizes = [8, 32], strides = [1, 1]} : vector<8x128xf32> to vector<8x32xf32>
    %269 = arith.mulf %265, %225 : vector<8x32xf32>
    %270 = arith.mulf %264, %267 : vector<8x32xf32>
    %271 = arith.addf %269, %270 : vector<8x32xf32>
    %272 = math.tanh %271 : vector<8x32xf32>
    %273 = arith.mulf %268, %272 : vector<8x32xf32>
    %274 = arith.truncf %273 : vector<8x32xf32> to vector<8x32xbf16>
    %cst_53 = arith.constant dense<0.000000e+00> : vector<8x128xf32>
    %275 = tpu.matmul %274, %2, %cst_53 {dimension_numbers = #tpu.dot_dimension_numbers<[1], [0], [0], [1], [0, 0, 1, 1], [], []>} : vector<8x32xbf16>, vector<32x128xbf16>, vector<8x128xf32> -> vector<8x128xf32>
    %276 = arith.addf %275, %254 : vector<8x128xf32>
    %277 = vector.broadcast %7 : vector<1x128xf32> to vector<8x128xf32>
    %278 = arith.addf %276, %277 : vector<8x128xf32>
    %279 = arith.negf %278 : vector<8x128xf32>
    %280 = math.exp %279 : vector<8x128xf32>
    %cst_54 = arith.constant 1.000000e+00 : f32
    %281 = vector.broadcast %cst_54 : f32 to vector<8x128xf32>
    %282 = arith.addf %281, %280 : vector<8x128xf32>
    %283 = arith.divf %281, %282 : vector<8x128xf32>
    %284 = vector.extract_strided_slice %283 {offsets = [0, 0], sizes = [8, 32], strides = [1, 1]} : vector<8x128xf32> to vector<8x32xf32>
    %285 = vector.extract_strided_slice %283 {offsets = [0, 32], sizes = [8, 32], strides = [1, 1]} : vector<8x128xf32> to vector<8x32xf32>
    %286 = vector.extract_strided_slice %278 {offsets = [0, 64], sizes = [8, 32], strides = [1, 1]} : vector<8x128xf32> to vector<8x32xf32>
    %287 = math.tanh %286 : vector<8x32xf32>
    %288 = vector.extract_strided_slice %283 {offsets = [0, 96], sizes = [8, 32], strides = [1, 1]} : vector<8x128xf32> to vector<8x32xf32>
    %289 = arith.mulf %285, %245 : vector<8x32xf32>
    %290 = arith.mulf %284, %287 : vector<8x32xf32>
    %291 = arith.addf %289, %290 : vector<8x32xf32>
    %292 = math.tanh %291 : vector<8x32xf32>
    %293 = arith.mulf %288, %292 : vector<8x32xf32>
    %294 = arith.truncf %293 : vector<8x32xf32> to vector<8x32xbf16>
    %cst_55 = arith.constant dense<0.000000e+00> : vector<8x128xf32>
    %295 = tpu.matmul %294, %4, %cst_55 {dimension_numbers = #tpu.dot_dimension_numbers<[1], [0], [0], [1], [0, 0, 1, 1], [], []>} : vector<8x32xbf16>, vector<32x128xbf16>, vector<8x128xf32> -> vector<8x128xf32>
    %296 = vector.broadcast %8 : vector<1x128xf32> to vector<8x128xf32>
    %297 = arith.addf %295, %296 : vector<8x128xf32>
    %c40 = arith.constant 40 : index
    %c0_56 = arith.constant 0 : index
    %298 = vector.load %arg3[%c40, %c0_56] : memref<64x128xf32, #tpu.memory_space<vmem>>, vector<8x128xf32>
    tpu.vector_store %arg3[%c40, %c0_56], %297 {strides = array<i32>} : memref<64x128xf32, #tpu.memory_space<vmem>>, vector<8x128xf32>,
    %299 = arith.truncf %293 : vector<8x32xf32> to vector<8x32xbf16>
    %cst_57 = arith.constant dense<0.000000e+00> : vector<8x128xf32>
    %300 = tpu.matmul %299, %3, %cst_57 {dimension_numbers = #tpu.dot_dimension_numbers<[1], [0], [0], [1], [0, 0, 1, 1], [], []>} : vector<8x32xbf16>, vector<32x128xbf16>, vector<8x128xf32> -> vector<8x128xf32>
    %301 = vector.extract_strided_slice %18 {offsets = [48, 0], sizes = [8, 128], strides = [1, 1]} : vector<64x128xf32> to vector<8x128xf32>
    %302 = arith.truncf %273 : vector<8x32xf32> to vector<8x32xbf16>
    %cst_58 = arith.constant dense<0.000000e+00> : vector<8x128xf32>
    %303 = tpu.matmul %302, %1, %cst_58 {dimension_numbers = #tpu.dot_dimension_numbers<[1], [0], [0], [1], [0, 0, 1, 1], [], []>} : vector<8x32xbf16>, vector<32x128xbf16>, vector<8x128xf32> -> vector<8x128xf32>
    %304 = arith.addf %301, %303 : vector<8x128xf32>
    %305 = arith.negf %304 : vector<8x128xf32>
    %306 = math.exp %305 : vector<8x128xf32>
    %cst_59 = arith.constant 1.000000e+00 : f32
    %307 = vector.broadcast %cst_59 : f32 to vector<8x128xf32>
    %308 = arith.addf %307, %306 : vector<8x128xf32>
    %309 = arith.divf %307, %308 : vector<8x128xf32>
    %310 = vector.extract_strided_slice %309 {offsets = [0, 0], sizes = [8, 32], strides = [1, 1]} : vector<8x128xf32> to vector<8x32xf32>
    %311 = vector.extract_strided_slice %309 {offsets = [0, 32], sizes = [8, 32], strides = [1, 1]} : vector<8x128xf32> to vector<8x32xf32>
    %312 = vector.extract_strided_slice %304 {offsets = [0, 64], sizes = [8, 32], strides = [1, 1]} : vector<8x128xf32> to vector<8x32xf32>
    %313 = math.tanh %312 : vector<8x32xf32>
    %314 = vector.extract_strided_slice %309 {offsets = [0, 96], sizes = [8, 32], strides = [1, 1]} : vector<8x128xf32> to vector<8x32xf32>
    %315 = arith.mulf %311, %271 : vector<8x32xf32>
    %316 = arith.mulf %310, %313 : vector<8x32xf32>
    %317 = arith.addf %315, %316 : vector<8x32xf32>
    %318 = math.tanh %317 : vector<8x32xf32>
    %319 = arith.mulf %314, %318 : vector<8x32xf32>
    %320 = arith.truncf %319 : vector<8x32xf32> to vector<8x32xbf16>
    %cst_60 = arith.constant dense<0.000000e+00> : vector<8x128xf32>
    %321 = tpu.matmul %320, %2, %cst_60 {dimension_numbers = #tpu.dot_dimension_numbers<[1], [0], [0], [1], [0, 0, 1, 1], [], []>} : vector<8x32xbf16>, vector<32x128xbf16>, vector<8x128xf32> -> vector<8x128xf32>
    %322 = arith.addf %321, %300 : vector<8x128xf32>
    %323 = vector.broadcast %7 : vector<1x128xf32> to vector<8x128xf32>
    %324 = arith.addf %322, %323 : vector<8x128xf32>
    %325 = arith.negf %324 : vector<8x128xf32>
    %326 = math.exp %325 : vector<8x128xf32>
    %cst_61 = arith.constant 1.000000e+00 : f32
    %327 = vector.broadcast %cst_61 : f32 to vector<8x128xf32>
    %328 = arith.addf %327, %326 : vector<8x128xf32>
    %329 = arith.divf %327, %328 : vector<8x128xf32>
    %330 = vector.extract_strided_slice %329 {offsets = [0, 0], sizes = [8, 32], strides = [1, 1]} : vector<8x128xf32> to vector<8x32xf32>
    %331 = vector.extract_strided_slice %329 {offsets = [0, 32], sizes = [8, 32], strides = [1, 1]} : vector<8x128xf32> to vector<8x32xf32>
    %332 = vector.extract_strided_slice %324 {offsets = [0, 64], sizes = [8, 32], strides = [1, 1]} : vector<8x128xf32> to vector<8x32xf32>
    %333 = math.tanh %332 : vector<8x32xf32>
    %334 = vector.extract_strided_slice %329 {offsets = [0, 96], sizes = [8, 32], strides = [1, 1]} : vector<8x128xf32> to vector<8x32xf32>
    %335 = arith.mulf %331, %291 : vector<8x32xf32>
    %336 = arith.mulf %330, %333 : vector<8x32xf32>
    %337 = arith.addf %335, %336 : vector<8x32xf32>
    %338 = math.tanh %337 : vector<8x32xf32>
    %339 = arith.mulf %334, %338 : vector<8x32xf32>
    %340 = arith.truncf %339 : vector<8x32xf32> to vector<8x32xbf16>
    %cst_62 = arith.constant dense<0.000000e+00> : vector<8x128xf32>
    %341 = tpu.matmul %340, %4, %cst_62 {dimension_numbers = #tpu.dot_dimension_numbers<[1], [0], [0], [1], [0, 0, 1, 1], [], []>} : vector<8x32xbf16>, vector<32x128xbf16>, vector<8x128xf32> -> vector<8x128xf32>
    %342 = vector.broadcast %8 : vector<1x128xf32> to vector<8x128xf32>
    %343 = arith.addf %341, %342 : vector<8x128xf32>
    %c48 = arith.constant 48 : index
    %c0_63 = arith.constant 0 : index
    %344 = vector.load %arg3[%c48, %c0_63] : memref<64x128xf32, #tpu.memory_space<vmem>>, vector<8x128xf32>
    tpu.vector_store %arg3[%c48, %c0_63], %343 {strides = array<i32>} : memref<64x128xf32, #tpu.memory_space<vmem>>, vector<8x128xf32>,
    %345 = arith.truncf %339 : vector<8x32xf32> to vector<8x32xbf16>
    %cst_64 = arith.constant dense<0.000000e+00> : vector<8x128xf32>
    %346 = tpu.matmul %345, %3, %cst_64 {dimension_numbers = #tpu.dot_dimension_numbers<[1], [0], [0], [1], [0, 0, 1, 1], [], []>} : vector<8x32xbf16>, vector<32x128xbf16>, vector<8x128xf32> -> vector<8x128xf32>
    %347 = vector.extract_strided_slice %18 {offsets = [56, 0], sizes = [8, 128], strides = [1, 1]} : vector<64x128xf32> to vector<8x128xf32>
    %348 = arith.truncf %319 : vector<8x32xf32> to vector<8x32xbf16>
    %cst_65 = arith.constant dense<0.000000e+00> : vector<8x128xf32>
    %349 = tpu.matmul %348, %1, %cst_65 {dimension_numbers = #tpu.dot_dimension_numbers<[1], [0], [0], [1], [0, 0, 1, 1], [], []>} : vector<8x32xbf16>, vector<32x128xbf16>, vector<8x128xf32> -> vector<8x128xf32>
    %350 = arith.addf %347, %349 : vector<8x128xf32>
    %351 = arith.negf %350 : vector<8x128xf32>
    %352 = math.exp %351 : vector<8x128xf32>
    %cst_66 = arith.constant 1.000000e+00 : f32
    %353 = vector.broadcast %cst_66 : f32 to vector<8x128xf32>
    %354 = arith.addf %353, %352 : vector<8x128xf32>
    %355 = arith.divf %353, %354 : vector<8x128xf32>
    %356 = vector.extract_strided_slice %355 {offsets = [0, 0], sizes = [8, 32], strides = [1, 1]} : vector<8x128xf32> to vector<8x32xf32>
    %357 = vector.extract_strided_slice %355 {offsets = [0, 32], sizes = [8, 32], strides = [1, 1]} : vector<8x128xf32> to vector<8x32xf32>
    %358 = vector.extract_strided_slice %350 {offsets = [0, 64], sizes = [8, 32], strides = [1, 1]} : vector<8x128xf32> to vector<8x32xf32>
    %359 = math.tanh %358 : vector<8x32xf32>
    %360 = vector.extract_strided_slice %355 {offsets = [0, 96], sizes = [8, 32], strides = [1, 1]} : vector<8x128xf32> to vector<8x32xf32>
    %361 = arith.mulf %357, %317 : vector<8x32xf32>
    %362 = arith.mulf %356, %359 : vector<8x32xf32>
    %363 = arith.addf %361, %362 : vector<8x32xf32>
    %364 = math.tanh %363 : vector<8x32xf32>
    %365 = arith.mulf %360, %364 : vector<8x32xf32>
    %366 = arith.truncf %365 : vector<8x32xf32> to vector<8x32xbf16>
    %cst_67 = arith.constant dense<0.000000e+00> : vector<8x128xf32>
    %367 = tpu.matmul %366, %2, %cst_67 {dimension_numbers = #tpu.dot_dimension_numbers<[1], [0], [0], [1], [0, 0, 1, 1], [], []>} : vector<8x32xbf16>, vector<32x128xbf16>, vector<8x128xf32> -> vector<8x128xf32>
    %368 = arith.addf %367, %346 : vector<8x128xf32>
    %369 = vector.broadcast %7 : vector<1x128xf32> to vector<8x128xf32>
    %370 = arith.addf %368, %369 : vector<8x128xf32>
    %371 = arith.negf %370 : vector<8x128xf32>
    %372 = math.exp %371 : vector<8x128xf32>
    %cst_68 = arith.constant 1.000000e+00 : f32
    %373 = vector.broadcast %cst_68 : f32 to vector<8x128xf32>
    %374 = arith.addf %373, %372 : vector<8x128xf32>
    %375 = arith.divf %373, %374 : vector<8x128xf32>
    %376 = vector.extract_strided_slice %375 {offsets = [0, 0], sizes = [8, 32], strides = [1, 1]} : vector<8x128xf32> to vector<8x32xf32>
    %377 = vector.extract_strided_slice %375 {offsets = [0, 32], sizes = [8, 32], strides = [1, 1]} : vector<8x128xf32> to vector<8x32xf32>
    %378 = vector.extract_strided_slice %370 {offsets = [0, 64], sizes = [8, 32], strides = [1, 1]} : vector<8x128xf32> to vector<8x32xf32>
    %379 = math.tanh %378 : vector<8x32xf32>
    %380 = vector.extract_strided_slice %375 {offsets = [0, 96], sizes = [8, 32], strides = [1, 1]} : vector<8x128xf32> to vector<8x32xf32>
    %381 = arith.mulf %377, %337 : vector<8x32xf32>
    %382 = arith.mulf %376, %379 : vector<8x32xf32>
    %383 = arith.addf %381, %382 : vector<8x32xf32>
    %384 = math.tanh %383 : vector<8x32xf32>
    %385 = arith.mulf %380, %384 : vector<8x32xf32>
    %386 = arith.truncf %385 : vector<8x32xf32> to vector<8x32xbf16>
    %cst_69 = arith.constant dense<0.000000e+00> : vector<8x128xf32>
    %387 = tpu.matmul %386, %4, %cst_69 {dimension_numbers = #tpu.dot_dimension_numbers<[1], [0], [0], [1], [0, 0, 1, 1], [], []>} : vector<8x32xbf16>, vector<32x128xbf16>, vector<8x128xf32> -> vector<8x128xf32>
    %388 = vector.broadcast %8 : vector<1x128xf32> to vector<8x128xf32>
    %389 = arith.addf %387, %388 : vector<8x128xf32>
    %c56 = arith.constant 56 : index
    %c0_70 = arith.constant 0 : index
    %390 = vector.load %arg3[%c56, %c0_70] : memref<64x128xf32, #tpu.memory_space<vmem>>, vector<8x128xf32>
    tpu.vector_store %arg3[%c56, %c0_70], %389 {strides = array<i32>} : memref<64x128xf32, #tpu.memory_space<vmem>>, vector<8x128xf32>,
    return
  }
}

</mosaic_0001>

<bundles_post_ra>
// kernel: tpu_custom_call.1
= control target key start
LH: loop header
LB: loop body
LE: loop exit
PB: predicated region body
PF: predicated region fallthrough
CT: control target
= control target key end

     0   :  { %8 = vsyncpa [#allocation3], 0  ;;  %s3264_s0 = inlined_call_operand.vmem [shape: s32[64,1], index: 0, kind: input, shape index: {}]   ;;  %s3265_s1 = inlined_call_operand.hbm [shape: bf16[160,128], index: 1, kind: input, shape index: {}]   ;;  %s3266_s2 = inlined_call_operand.vmem [shape: f32[3,128], index: 2, kind: input, shape index: {}]   ;;  %s3267_s3 = inlined_call_operand.hbm [shape: f32[64,128], index: 3, kind: output, shape index: {}]  }
   0x1   :  { %9 = vsyncpa [#allocation4], 0  ;;  %s2727_s12 = smov [#allocation2]   ;;  %s2679_s16 = scalar_lea.hbm %s3265_s1, 1280 }
   0x2   :  { %s17_s13 = sshll.u32 %s2727_s12, 4  ;;  %p2680_p0 = scmp.ne.s32.totalorder %s3265_s1, %s2679_s16  ;;  %s18_s13 = int_to_ptr.vmem [resolvable:$true] %s17_s13 }
   0x3   :  { %p2683_p1 = scmp.lt.u32.totalorder %s2679_s16, %s3265_s1 }
   0x5   :  { %p2685_p2 = pnand %p2683_p1, %p2680_p0 }
   0x7   :  { %2688 = shalt.err (!%p2685_p2)
}
   0x8   :  { %s2689_s21 = scalar_lea.vmem %s18_s13, 1280  ;;  %p2694_p4 = scmp.lt.s32.totalorder %s18_s13, %s18_s13 }
   0x9   :  { %p2690_p3 = scmp.ne.s32.totalorder %s18_s13, %s2689_s21  ;;  %p2695_p5 = scmp.lt.s32.totalorder %s2689_s21, %s2689_s21 }
   0xb   :  { %p2696_p6 = por %p2695_p5, %p2694_p4 }
   0xd   :  { %p2697_p7 = pnand %p2696_p6, %p2690_p3 }
   0xf   :  { %2700 = shalt.err (!%p2697_p7)
}
  0x10   :  { %s2728_s22 = smov 64   ;;  %s2729_s23 = smov 4  }
  0x11   :  { %23 = dma.hbm_to_vmem [thread:$0]  %s3265_s1, 1280, %s18_s13, [#allocation3], %s2728_s22, %s2728_s22, %s2729_s23  }
  0x12   :  { %2723 = dma.done.wait [#allocation3], 1280  }
  0x13   :  { %2724 = vsyncadd [#allocation3], 4294966016  ;;  %v2730_v0 = vmov 0   ;;  %v2731_v1 = vmov 0.0   ;;  %v53_v2 = vld [vmem:[%s3264_s0 + $0x10] sm:$0xff]  ;;  %v51_v3 = vld [vmem:[%s3264_s0] sm:$0xff]  ;;  %v59_v12 = vlaneseq }
  0x14   :  { %2532 = vset.pattern.permute.xlu1 %v2730_v0  ;;  %2531 = vset.pattern.permute.xlu0 %v2730_v0  ;;  %v54_v4 = vld [vmem:[%s3264_s0 + $0x18] sm:$0xff]  ;;  %v52_v5 = vld [vmem:[%s3264_s0 + $0x8] sm:$0xff]  ;;  %vm2732_vm0 = vmmov 0   ;;  %v2788_v7 = vld [vmem:[#allocation2 + $0x38] sm:$0xff]   ;;  %vm129_vm5 = vcmask 261120  }
  0x15   :  { %2265 = vmatprep.subr.bf16.mxu1 %v2731_v1  ;;  %68 = vperm.xlu1 %2532, %v53_v2   ;;  %v2784_v6 = vld [vmem:[#allocation2 + $0x30] sm:$0xff]   ;;  %v2535_v8 = vld [vmem:[#allocation2] sm:$0xff]   ;;  %v2537_v9 = vld [vmem:[#allocation2 + $0x8] sm:$0xff]   ;;  %v2807_v13 = vand.u32 127, %v59_v12  ;;  %v2821_v32 = vshrl.u32 %v59_v12, 7 }
  0x16   :  { %62 = vperm.xlu0 %2531, %v51_v3   ;;  %2269 = vmatprep.mubr.msk.bf16.mxu1 %vm2732_vm0, %v2731_v1  ;;  %v2792_v10 = vld [vmem:[#allocation2 + $0x10] sm:$0xff]   ;;  %v2797_v11 = vld [vmem:[#allocation2 + $0x18] sm:$0xff]   ;;  %v57_v50 = vld [vmem:[%s3264_s0 + $0x30] sm:$0xff] }
  0x17   :  { %2266 = vmatpush3.bf16.msra.mxu1 %v2784_v6  ;;  %2253 = vmatprep.subr.bf16.mxu0 %v2535_v8  ;;  %v115_v33 = vsub.s32 0, %v2821_v32  ;;  %v2827_v34 = vld [vmem:[%s3266_s2] sm:$0x7]  ;;  %s2733_s2 = smov 32   ;;  %v56_v55 = vld [vmem:[%s3264_s0 + $0x28] sm:$0xff]  ;;  %v58_v56 = vld [vmem:[%s3264_s0 + $0x38] sm:$0xff] }
  0x18   :  { %2267 = vmatprep.subr.bf16.mxu1 %v2731_v1  ;;  %2254 = vmatpush3.bf16.msra.mxu0 %v2535_v8  ;;  %v55_v49 = vld [vmem:[%s3264_s0 + $0x20] sm:$0xff]  ;;  %v2857_v57 = vld [vmem:[#allocation2 + $0x20] sm:$0xff]   ;;  %v2860_v58 = vld [vmem:[#allocation2 + $0x28] sm:$0xff]   ;;  %s2734_s0 = smov [#allocation5]  }
  0x19   :  { %71 = vperm.xlu1 %2532, %v54_v4   ;;  %2255 = vmatprep.subr.bf16.mxu0 %v2537_v9  ;;  %v2830_v35 = vrot.slane %v2827_v34, %v115_v33  ;;  %s2071_s16 = sshll.u32 %s2734_s0, 4  ;;  %s2072_s16 = int_to_ptr.vmem [resolvable:$true] %s2071_s16 }
  0x1a   :  { %65 = vperm.xlu0 %2531, %v52_v5   ;;  %s2701_s17 = scalar_lea.vmem %s2072_s16, 1024  ;;  %p2706_p9 = scmp.lt.s32.totalorder %s2072_s16, %s2072_s16 }
  0x1b   :  { %2268 = vmatpush3.bf16.msra.mxu1 %v2788_v7  ;;  %p2702_p8 = scmp.ne.s32.totalorder %s2072_s16, %s2701_s17  ;;  %p2707_p10 = scmp.lt.s32.totalorder %s2701_s17, %s2701_s17 }
  0x1c   :  { %2273 = vmatprep.subr.bf16.mxu1 %v2731_v1  ;;  %2256 = vmatpush3.bf16.msra.mxu0 %v2537_v9 }
  0x1d   :  { %2281 = vmatprep.subr.bf16.mxu0 %v2731_v1  ;;  %p2708_p11 = por %p2707_p10, %p2706_p9 }
  0x1e   :  { %2270 = vmatmul.mubr.bf16.vlgmr.msra.gmra.mrb[0].mxu1 %v2730_v0 }
  0x1f   :  { %2274 = vmatpush3.bf16.msra.mxu1 %v2792_v10  ;;  %2277 = vmatprep.mubr.msk.bf16.mxu1 %vm2732_vm0, %v2731_v1  ;;  %p2709_p12 = pnand %p2708_p11, %p2702_p8 }
  0x20   :  { %2275 = vmatprep.subr.bf16.mxu1 %v2731_v1 }
  0x23   :  { %2276 = vmatpush3.bf16.msra.mxu1 %v2797_v11 }
  0x24   :  { %2289 = vmatprep.subr.bf16.mxu1 %v2731_v1 }
  0x26   :  { %2278 = vmatmul.mubr.bf16.vlgmr.msra.gmra.mrb[4].mxu1 %v2730_v0 }
  0x27   :  { %2293 = vmatprep.mubr.msk.bf16.mxu1 %vm2732_vm0, %v2731_v1 }
  0x94   :  { %v69_v14 = vpop.permute.xlu1 %68 }
  0x95   :  { %v63_v15 = vpop.permute.xlu0 %62  ;;  %vm87_vm1 = vcmp.eq.s32.totalorder %v2807_v13, %v69_v14 }
  0x96   :  { %vm85_vm2 = vcmp.eq.s32.totalorder %v2807_v13, %v63_v15  ;;  %v2085_v18 = vsel %vm87_vm1, 1.0, %v2731_v1 }
  0x97   :  { %v2083_v19 = vsel %vm85_vm2, 1.0, %v2731_v1 }
  0x98   :  { %v72_v16 = vpop.permute.xlu1 %71 }
  0x99   :  { %v66_v17 = vpop.permute.xlu0 %65  ;;  %vm88_vm3 = vcmp.eq.s32.totalorder %v2807_v13, %v72_v16 }
  0x9a   :  { %vm86_vm4 = vcmp.eq.s32.totalorder %v2807_v13, %v66_v17  ;;  %v2086_v20 = vsel %vm88_vm3, 1.0, %v2731_v1 }
  0x9b   :  { %v2084_v21 = vsel %vm86_vm4, 1.0, %v2731_v1  ;;  %v110_v22 = vpack.c.bf16 %v2086_v20, %v2085_v18  ;;  %v400_v18 = vsub.s32 1, %v2821_v32 }
  0x9c   :  { %v109_v23 = vpack.c.bf16 %v2084_v21, %v2083_v19 }
  0x9d   :  { %v2895_v19 = vrot.slane %v2827_v34, %v400_v18 }
  0x9e   :  { %2257 = vmatprep.mubr.msk.bf16.mxu0 %vm129_vm5, %v109_v23 }
  0x9f   :  { %2258 = vmatmul.mubr.msk.bf16.vlgmr.msra.gmra.mrb[0].mxu0 %vm129_vm5, %v110_v22 }
  0xa0   :  { %2282 = vmatpush3.bf16.msra.mxu0 %v2857_v57 }
  0xa1   :  { %2283 = vmatprep.subr.bf16.mxu0 %v2731_v1 }
  0xa4   :  { %2284 = vmatpush3.bf16.msra.mxu0 %v2860_v58 }
  0xa5   :  { %2297 = vmatprep.subr.bf16.mxu0 %v2731_v1 }
  0xf1   :  { %v2819_v24 = vpop.f32.mrb[0].mxu1 }
  0xf2   :  { %v2271_v25 = vpop.f32.mrb[1].mxu1 }
  0xf3   :  { %v259_v26 = vpop.f32.mrb[2].mxu1 }
  0xf4   :  { %v2272_v27 = vpop.f32.mrb[3].mxu1 }
  0xf9   :  { %v308_v28 = vpop.f32.mrb[4].mxu1 }
  0xfa   :  { %v2279_v29 = vpop.f32.mrb[5].mxu1 }
  0xfb   :  { %v311_v30 = vpop.f32.mrb[6].mxu1 }
  0xfc   :  { %v2280_v31 = vpop.f32.mrb[7].mxu1 }
 0x172   :  { %v2832_v36 = vpop.f32.mrb[0].mxu0 }
 0x173   :  { %v176_v37 = vpop.f32.mrb[1].mxu0 }
 0x174   :  { %v177_v38 = vadd.f32 %v176_v37, %v2830_v35  ;;  %v2835_v39 = vpop.f32.mrb[2].mxu0 }
 0x175   :  { %v2837_v40 = vpop.f32.mrb[3].mxu0 }
 0x176   :  { %v314_v41 = vadd.f32 %v308_v28, %v177_v38 }
 0x178   :  { %2543 = vtanh.f32 %v314_v41  ;;  %v2101_v43 = vmul.f32 -1.442695, %v314_v41 }
 0x17a   :  { %2545 = vpow2.f32 %v2101_v43  ;;  %v2907_v43 = vld [vmem:[#allocation2 + $0x48] sm:$0xff]  }
 0x182   :  { %v2544_v42 = vpop.eup %2543 }
 0x183   :  { %324 = vrot.lane.b32.xlu0 %v2544_v42, %s2728_s22  ;;  %v2904_v42 = vld [vmem:[#allocation2 + $0x40] sm:$0xff]  }
 0x184   :  { %v2546_v44 = vpop.eup %2545  ;;  %2290 = vmatpush3.bf16.msra.mxu1 %v2904_v42 }
 0x185   :  { %v318_v45 = vadd.f32 1.0, %v2546_v44  ;;  %2291 = vmatprep.subr.bf16.mxu1 %v2731_v1 }
 0x187   :  { %2547 = vrcp.f32 %v318_v45 }
 0x188   :  { %2292 = vmatpush3.bf16.msra.mxu1 %v2907_v43 }
 0x189   :  { %2305 = vmatprep.subr.bf16.mxu1 %v2731_v1 }
 0x191   :  { %v2548_v46 = vpop.eup %2547 }
 0x192   :  { %v322_v51 = vmul.f32 0.0, %v2548_v46 }
 0x1f5   :  { %v325_v47 = vpop.permute.xlu0 %324 }
 0x1f6   :  { %v327_v48 = vmul.f32 %v2548_v46, %v325_v47 }
 0x1f8   :  { %329 = vrot.lane.b32.xlu1 %v327_v48, %s2733_s2 }
 0x1fc   :  { %74 = vperm.xlu1 %2532, %v55_v49   ;;  %v430_v49 = vsub.s32 2, %v2821_v32 }
 0x200   :  { %80 = vperm.xlu1 %2532, %v57_v50   ;;  %v2937_v50 = vrot.slane %v2827_v34, %v430_v49 }
 0x26a   :  { %v330_v52 = vpop.permute.xlu1 %329 }
 0x26b   :  { %v2847_v53 = vadd.f32 %v330_v52, %v322_v51 }
 0x26d   :  { %2549 = vtanh.f32 %v2847_v53 }
 0x277   :  { %v2550_v54 = vpop.eup %2549 }
 0x278   :  { %335 = vrot.lane.b32.xlu0 %v2550_v54, %s2728_s22 }
 0x27b   :  { %v75_v62 = vpop.permute.xlu1 %74 }
 0x27c   :  { %77 = vperm.xlu0 %2531, %v56_v55   ;;  %vm89_vm6 = vcmp.eq.s32.totalorder %v2807_v13, %v75_v62 }
 0x27d   :  { %v2087_v2 = vsel %vm89_vm6, 1.0, %v2731_v1 }
 0x27f   :  { %v81_v63 = vpop.permute.xlu1 %80 }
 0x280   :  { %83 = vperm.xlu0 %2531, %v58_v56   ;;  %vm91_vm8 = vcmp.eq.s32.totalorder %v2807_v13, %v81_v63  ;;  %v180_v63 = vadd.f32 %v2837_v40, %v2830_v35 }
 0x281   :  { %v2089_v8 = vsel %vm91_vm8, 1.0, %v2731_v1 }
 0x2ea   :  { %v336_v59 = vpop.permute.xlu0 %335 }
 0x2eb   :  { %v338_v60 = vmul.f32 %v2548_v46, %v336_v59 }
 0x2ed   :  { %v339_v61 = vpack.c.bf16 %v338_v60, %v338_v60 }
 0x2ef   :  { %341 = vrot.lane.b32.xlu1 %v339_v61, %s2733_s2 }
 0x2fb   :  { %v78_v0 = vpop.permute.xlu0 %77 }
 0x2fc   :  { %vm90_vm7 = vcmp.eq.s32.totalorder %v2807_v13, %v78_v0 }
 0x2fd   :  { %v2088_v3 = vsel %vm90_vm7, 1.0, %v2731_v1 }
 0x2fe   :  { %v111_v4 = vpack.c.bf16 %v2088_v3, %v2087_v2 }
 0x2ff   :  { %v84_v5 = vpop.permute.xlu0 %83 }
 0x300   :  { %vm92_vm9 = vcmp.eq.s32.totalorder %v2807_v13, %v84_v5  ;;  %2261 = vmatprep.mubr.msk.bf16.mxu0 %vm129_vm5, %v111_v4 }
 0x301   :  { %v2090_v9 = vsel %vm92_vm9, 1.0, %v2731_v1 }
 0x302   :  { %v112_v12 = vpack.c.bf16 %v2090_v9, %v2089_v8 }
 0x304   :  { %2262 = vmatmul.mubr.msk.bf16.gmra.mrb[4].mxu0 %vm129_vm5, %v112_v12 }
 0x305   :  { %2285 = vmatprep.mubr.msk.bf16.mxu0 %vm2732_vm0, %v2731_v1 }
 0x361   :  { %v342_v14 = vpop.permute.xlu1 %341 }
 0x362   :  { %2286 = vmatmul.mubr.msk.bf16.vlgmr.msra.gmra.mrb[8].mxu0 %vm129_vm5, %v342_v14 }
 0x363   :  { %2298 = vmatpush3.bf16.msra.mxu0 %v2784_v6  ;;  %2301 = vmatprep.mubr.msk.bf16.mxu0 %vm2732_vm0, %v2731_v1 }
 0x364   :  { %2299 = vmatprep.subr.bf16.mxu0 %v2731_v1 }
 0x367   :  { %2300 = vmatpush3.bf16.msra.mxu0 %v2788_v7 }
 0x368   :  { %2313 = vmatprep.subr.bf16.mxu0 %v2731_v1 }
 0x3d7   :  { %v2885_v13 = vpop.f32.mrb[4].mxu0 }
 0x3d8   :  { %v2887_v15 = vpop.f32.mrb[5].mxu0 }
 0x3d9   :  { %v2889_v16 = vpop.f32.mrb[6].mxu0 }
 0x3da   :  { %v2891_v17 = vpop.f32.mrb[7].mxu0 }
 0x435   :  { %v392_v20 = vpop.f32.mrb[8].mxu0 }
 0x436   :  { %v393_v21 = vadd.f32 %v392_v20, %v2819_v24  ;;  %v2287_v22 = vpop.f32.mrb[9].mxu0 }
 0x437   :  { %v395_v23 = vpop.f32.mrb[10].mxu0 }
 0x438   :  { %v402_v25 = vadd.f32 %v2895_v19, %v393_v21  ;;  %v2288_v26 = vpop.f32.mrb[11].mxu0 }
 0x43a   :  { %2551 = vtanh.f32 %v402_v25  ;;  %v2105_v28 = vmul.f32 -1.442695, %v402_v25 }
 0x43c   :  { %2553 = vpow2.f32 %v2105_v28 }
 0x444   :  { %v2552_v27 = vpop.eup %2551 }
 0x445   :  { %412 = vrot.lane.b32.xlu0 %v2552_v27, %s2728_s22 }
 0x446   :  { %v2554_v29 = vpop.eup %2553 }
 0x447   :  { %v406_v30 = vadd.f32 1.0, %v2554_v29 }
 0x449   :  { %2555 = vrcp.f32 %v406_v30 }
 0x453   :  { %v2556_v31 = vpop.eup %2555 }
 0x454   :  { %v410_v24 = vmul.f32 0.0, %v2556_v31 }
 0x4b7   :  { %v413_v33 = vpop.permute.xlu0 %412 }
 0x4b8   :  { %v415_v37 = vmul.f32 %v2556_v31, %v413_v33 }
 0x4ba   :  { %417 = vrot.lane.b32.xlu1 %v415_v37, %s2733_s2 }
 0x52c   :  { %v418_v38 = vpop.permute.xlu1 %417 }
 0x52d   :  { %v2901_v41 = vadd.f32 %v418_v38, %v410_v24 }
 0x52f   :  { %2557 = vtanh.f32 %v2901_v41 }
 0x539   :  { %v2558_v44 = vpop.eup %2557 }
 0x53a   :  { %423 = vrot.lane.b32.xlu0 %v2558_v44, %s2728_s22 }
 0x5ac   :  { %v424_v45 = vpop.permute.xlu0 %423 }
 0x5ad   :  { %v426_v46 = vmul.f32 %v2556_v31, %v424_v45 }
 0x5af   :  { %v427_v47 = vpack.c.bf16 %v426_v46, %v426_v46 }
 0x5b1   :  { %433 = vrot.lane.b32.xlu1 %v427_v47, %s2733_s2 }
 0x623   :  { %v434_v48 = vpop.permute.xlu1 %433 }
 0x624   :  { %2294 = vmatmul.mubr.msk.bf16.vlgmr.msra.gmra.mrb[8].mxu1 %vm129_vm5, %v434_v48  ;;  %2302 = vmatmul.mubr.msk.bf16.vlgmr.msra.gmra.mrb[12].mxu0 %vm129_vm5, %v434_v48 }
 0x625   :  { %2306 = vmatpush3.bf16.msra.mxu1 %v2792_v10  ;;  %2309 = vmatprep.mubr.msk.bf16.mxu1 %vm2732_vm0, %v2731_v1 }
 0x626   :  { %2307 = vmatprep.subr.bf16.mxu1 %v2731_v1  ;;  %2314 = vmatpush3.bf16.msra.mxu0 %v2857_v57 }
 0x627   :  { %2315 = vmatprep.subr.bf16.mxu0 %v2731_v1  ;;  %2317 = vmatprep.mubr.msk.bf16.mxu0 %vm2732_vm0, %v2731_v1 }
 0x629   :  { %2308 = vmatpush3.bf16.msra.mxu1 %v2797_v11 }
 0x62a   :  { %2316 = vmatpush3.bf16.msra.mxu0 %v2860_v58  ;;  %2321 = vmatprep.subr.bf16.mxu1 %v2731_v1 }
 0x62b   :  { %2329 = vmatprep.subr.bf16.mxu0 %v2731_v1 }
 0x62c   :  { %2310 = vmatmul.mubr.msk.bf16.vlgmr.msra.gmra.mrb[12].mxu1 %vm129_vm5, %v342_v14 }
 0x62d   :  { %2322 = vmatpush3.bf16.msra.mxu1 %v2904_v42  ;;  %2325 = vmatprep.mubr.msk.bf16.mxu1 %vm2732_vm0, %v2731_v1 }
 0x62e   :  { %2323 = vmatprep.subr.bf16.mxu1 %v2731_v1 }
 0x631   :  { %2324 = vmatpush3.bf16.msra.mxu1 %v2907_v43 }
 0x632   :  { %2337 = vmatprep.subr.bf16.mxu1 %v2731_v1 }
 0x6f7   :  { %v484_v51 = vpop.f32.mrb[8].mxu1  ;;  %v525_v52 = vpop.f32.mrb[12].mxu0 }
 0x6f8   :  { %v485_v54 = vadd.f32 %v484_v51, %v2937_v50  ;;  %v2295_v55 = vpop.f32.mrb[9].mxu1  ;;  %v2303_v56 = vpop.f32.mrb[13].mxu0 }
 0x6f9   :  { %v487_v59 = vpop.f32.mrb[10].mxu1  ;;  %v528_v60 = vpop.f32.mrb[14].mxu0 }
 0x6fa   :  { %490 = vst [vmem:[#allocation5] sm:$0xff] %v485_v54  ;;  %v2296_v61 = vpop.f32.mrb[11].mxu1  ;;  %v2304_v62 = vpop.f32.mrb[15].mxu0 }
 0x6ff   :  { %v565_v0 = vpop.f32.mrb[12].mxu1 }
 0x700   :  { %v571_v2 = vadd.f32 %v565_v0, %v180_v63  ;;  %v2311_v32 = vpop.f32.mrb[13].mxu1 }
 0x701   :  { %v568_v3 = vpop.f32.mrb[14].mxu1 }
 0x702   :  { %2559 = vtanh.f32 %v571_v2  ;;  %v2312_v34 = vpop.f32.mrb[15].mxu1  ;;  %v2111_v5 = vmul.f32 -1.442695, %v571_v2 }
 0x703   :  { %v185_v34 = vadd.f32 %v2832_v36, %v2830_v35 }
 0x704   :  { %2561 = vpow2.f32 %v2111_v5 }
 0x70c   :  { %v2560_v4 = vpop.eup %2559 }
 0x70d   :  { %581 = vrot.lane.b32.xlu0 %v2560_v4, %s2728_s22 }
 0x70e   :  { %v2562_v8 = vpop.eup %2561 }
 0x70f   :  { %v575_v9 = vadd.f32 1.0, %v2562_v8 }
 0x711   :  { %2563 = vrcp.f32 %v575_v9 }
 0x71b   :  { %v2564_v12 = vpop.eup %2563 }
 0x71c   :  { %v579_v40 = vmul.f32 %v2564_v12, %v2847_v53 }
 0x77f   :  { %v582_v14 = vpop.permute.xlu0 %581 }
 0x780   :  { %v584_v18 = vmul.f32 %v2564_v12, %v582_v14 }
 0x782   :  { %586 = vrot.lane.b32.xlu1 %v584_v18, %s2733_s2 }
 0x7f4   :  { %v587_v20 = vpop.permute.xlu1 %586 }
 0x7f5   :  { %v2945_v21 = vadd.f32 %v587_v20, %v579_v40 }
 0x7f7   :  { %2565 = vtanh.f32 %v2945_v21 }
 0x801   :  { %v2566_v22 = vpop.eup %2565 }
 0x802   :  { %592 = vrot.lane.b32.xlu0 %v2566_v22, %s2728_s22 }
 0x874   :  { %v593_v23 = vpop.permute.xlu0 %592 }
 0x875   :  { %v595_v25 = vmul.f32 %v2564_v12, %v593_v23 }
 0x877   :  { %v596_v26 = vpack.c.bf16 %v595_v25, %v595_v25 }
 0x879   :  { %598 = vrot.lane.b32.xlu1 %v596_v26, %s2733_s2 }
 0x8eb   :  { %v599_v27 = vpop.permute.xlu1 %598 }
 0x8ec   :  { %2318 = vmatmul.mubr.msk.bf16.vlgmr.msra.gmra.mrb[16].mxu0 %vm129_vm5, %v599_v27 }
 0x8ed   :  { %2330 = vmatpush3.bf16.msra.mxu0 %v2784_v6  ;;  %2333 = vmatprep.mubr.msk.bf16.mxu0 %vm2732_vm0, %v2731_v1 }
 0x8ee   :  { %2331 = vmatprep.subr.bf16.mxu0 %v2731_v1 }
 0x8f1   :  { %2332 = vmatpush3.bf16.msra.mxu0 %v2788_v7 }
 0x8f2   :  { %2345 = vmatprep.subr.bf16.mxu0 %v2731_v1 }
 0x9bf   :  { %v637_v53 = vpop.f32.mrb[16].mxu0 }
 0x9c0   :  { %v638_v28 = vadd.f32 %v637_v53, %v525_v52  ;;  %v2319_v29 = vpop.f32.mrb[17].mxu0 }
 0x9c1   :  { %v640_v30 = vpop.f32.mrb[18].mxu0 }
 0x9c2   :  { %v643_v31 = vadd.f32 %v638_v28, %v2895_v19  ;;  %v2320_v33 = vpop.f32.mrb[19].mxu0 }
 0x9c4   :  { %2567 = vtanh.f32 %v643_v31  ;;  %v2113_v24 = vmul.f32 -1.442695, %v643_v31 }
 0x9c6   :  { %2569 = vpow2.f32 %v2113_v24 }
 0x9ce   :  { %v2568_v37 = vpop.eup %2567 }
 0x9cf   :  { %653 = vrot.lane.b32.xlu0 %v2568_v37, %s2728_s22 }
 0x9d0   :  { %v2570_v38 = vpop.eup %2569 }
 0x9d1   :  { %v647_v44 = vadd.f32 1.0, %v2570_v38 }
 0x9d3   :  { %2571 = vrcp.f32 %v647_v44 }
 0x9dd   :  { %v2572_v45 = vpop.eup %2571 }
 0x9de   :  { %v651_v48 = vmul.f32 %v2572_v45, %v2901_v41 }
 0xa41   :  { %v654_v46 = vpop.permute.xlu0 %653 }
 0xa42   :  { %v656_v47 = vmul.f32 %v2572_v45, %v654_v46 }
 0xa44   :  { %658 = vrot.lane.b32.xlu1 %v656_v47, %s2733_s2 }
 0xab6   :  { %v659_v49 = vpop.permute.xlu1 %658 }
 0xab7   :  { %v2961_v51 = vadd.f32 %v659_v49, %v651_v48 }
 0xab9   :  { %2573 = vtanh.f32 %v2961_v51 }
 0xac3   :  { %v2574_v52 = vpop.eup %2573 }
 0xac4   :  { %664 = vrot.lane.b32.xlu0 %v2574_v52, %s2728_s22 }
 0xb36   :  { %v665_v54 = vpop.permute.xlu0 %664 }
 0xb37   :  { %v667_v55 = vmul.f32 %v2572_v45, %v665_v54 }
 0xb39   :  { %v668_v56 = vpack.c.bf16 %v667_v55, %v667_v55 }
 0xb3b   :  { %670 = vrot.lane.b32.xlu1 %v668_v56, %s2733_s2 }
 0xbad   :  { %v671_v59 = vpop.permute.xlu1 %670 }
 0xbae   :  { %2326 = vmatmul.mubr.msk.bf16.vlgmr.msra.gmra.mrb[16].mxu1 %vm129_vm5, %v671_v59  ;;  %2334 = vmatmul.mubr.msk.bf16.vlgmr.msra.gmra.mrb[20].mxu0 %vm129_vm5, %v671_v59 }
 0xbaf   :  { %2338 = vmatpush3.bf16.msra.mxu1 %v2792_v10  ;;  %2341 = vmatprep.mubr.msk.bf16.mxu1 %vm2732_vm0, %v2731_v1 }
 0xbb0   :  { %2339 = vmatprep.subr.bf16.mxu1 %v2731_v1  ;;  %2346 = vmatpush3.bf16.msra.mxu0 %v2857_v57 }
 0xbb1   :  { %2347 = vmatprep.subr.bf16.mxu0 %v2731_v1  ;;  %2349 = vmatprep.mubr.msk.bf16.mxu0 %vm2732_vm0, %v2731_v1 }
 0xbb3   :  { %2340 = vmatpush3.bf16.msra.mxu1 %v2797_v11 }
 0xbb4   :  { %2348 = vmatpush3.bf16.msra.mxu0 %v2860_v58  ;;  %2353 = vmatprep.subr.bf16.mxu1 %v2731_v1 }
 0xbb5   :  { %2361 = vmatprep.subr.bf16.mxu0 %v2731_v1 }
 0xbb6   :  { %2342 = vmatmul.mubr.msk.bf16.vlgmr.msra.gmra.mrb[20].mxu1 %vm129_vm5, %v599_v27 }
 0xbb7   :  { %2354 = vmatpush3.bf16.msra.mxu1 %v2904_v42  ;;  %2357 = vmatprep.mubr.msk.bf16.mxu1 %vm2732_vm0, %v2731_v1 }
 0xbb8   :  { %2355 = vmatprep.subr.bf16.mxu1 %v2731_v1 }
 0xbbb   :  { %2356 = vmatpush3.bf16.msra.mxu1 %v2907_v43 }
 0xbbc   :  { %2369 = vmatprep.subr.bf16.mxu1 %v2731_v1 }
 0xc81   :  { %v709_v41 = vpop.f32.mrb[16].mxu1  ;;  %v750_v60 = vpop.f32.mrb[20].mxu0 }
 0xc82   :  { %v710_v61 = vadd.f32 %v709_v41, %v2937_v50  ;;  %v2327_v62 = vpop.f32.mrb[17].mxu1  ;;  %v2335_v63 = vpop.f32.mrb[21].mxu0 }
 0xc83   :  { %v712_v0 = vpop.f32.mrb[18].mxu1  ;;  %v753_v2 = vpop.f32.mrb[22].mxu0 }
 0xc84   :  { %715 = vst [vmem:[#allocation5 + $0x8] sm:$0xff] %v710_v61  ;;  %v2328_v32 = vpop.f32.mrb[19].mxu1  ;;  %v2336_v3 = vpop.f32.mrb[23].mxu0 }
 0xc89   :  { %v790_v4 = vpop.f32.mrb[20].mxu1 }
 0xc8a   :  { %v796_v5 = vadd.f32 %v790_v4, %v185_v34  ;;  %v2343_v8 = vpop.f32.mrb[21].mxu1 }
 0xc8b   :  { %v793_v9 = vpop.f32.mrb[22].mxu1 }
 0xc8c   :  { %2575 = vtanh.f32 %v796_v5  ;;  %v2344_v12 = vpop.f32.mrb[23].mxu1  ;;  %v2117_v18 = vmul.f32 -1.442695, %v796_v5  ;;  %v188_v9 = vadd.f32 %v2835_v39, %v2830_v35 }
 0xc8e   :  { %2577 = vpow2.f32 %v2117_v18 }
 0xc96   :  { %v2576_v14 = vpop.eup %2575 }
 0xc97   :  { %806 = vrot.lane.b32.xlu0 %v2576_v14, %s2728_s22 }
 0xc98   :  { %v2578_v40 = vpop.eup %2577 }
 0xc99   :  { %v800_v20 = vadd.f32 1.0, %v2578_v40 }
 0xc9b   :  { %2579 = vrcp.f32 %v800_v20 }
 0xca5   :  { %v2580_v22 = vpop.eup %2579 }
 0xca6   :  { %v804_v36 = vmul.f32 %v2580_v22, %v2945_v21 }
 0xd09   :  { %v807_v23 = vpop.permute.xlu0 %806 }
 0xd0a   :  { %v809_v25 = vmul.f32 %v2580_v22, %v807_v23 }
 0xd0c   :  { %811 = vrot.lane.b32.xlu1 %v809_v25, %s2733_s2 }
 0xd7e   :  { %v812_v26 = vpop.permute.xlu1 %811 }
 0xd7f   :  { %v2993_v27 = vadd.f32 %v812_v26, %v804_v36 }
 0xd81   :  { %2581 = vtanh.f32 %v2993_v27 }
 0xd8b   :  { %v2582_v53 = vpop.eup %2581 }
 0xd8c   :  { %817 = vrot.lane.b32.xlu0 %v2582_v53, %s2728_s22 }
 0xdfe   :  { %v818_v28 = vpop.permute.xlu0 %817 }
 0xdff   :  { %v820_v29 = vmul.f32 %v2580_v22, %v818_v28 }
 0xe01   :  { %v821_v30 = vpack.c.bf16 %v820_v29, %v820_v29 }
 0xe03   :  { %823 = vrot.lane.b32.xlu1 %v821_v30, %s2733_s2 }
 0xe75   :  { %v824_v31 = vpop.permute.xlu1 %823 }
 0xe76   :  { %2350 = vmatmul.mubr.msk.bf16.vlgmr.msra.gmra.mrb[24].mxu0 %vm129_vm5, %v824_v31 }
 0xe77   :  { %2362 = vmatpush3.bf16.msra.mxu0 %v2784_v6  ;;  %2365 = vmatprep.mubr.msk.bf16.mxu0 %vm2732_vm0, %v2731_v1 }
 0xe78   :  { %2363 = vmatprep.subr.bf16.mxu0 %v2731_v1 }
 0xe7b   :  { %2364 = vmatpush3.bf16.msra.mxu0 %v2788_v7 }
 0xe7c   :  { %2377 = vmatprep.subr.bf16.mxu0 %v2731_v1 }
 0xf49   :  { %v862_v21 = vpop.f32.mrb[24].mxu0 }
 0xf4a   :  { %v863_v33 = vadd.f32 %v862_v21, %v750_v60  ;;  %v2351_v37 = vpop.f32.mrb[25].mxu0 }
 0xf4b   :  { %v865_v24 = vpop.f32.mrb[26].mxu0 }
 0xf4c   :  { %v868_v38 = vadd.f32 %v863_v33, %v2895_v19  ;;  %v2352_v44 = vpop.f32.mrb[27].mxu0 }
 0xf4e   :  { %2583 = vtanh.f32 %v868_v38  ;;  %v2119_v46 = vmul.f32 -1.442695, %v868_v38 }
 0xf50   :  { %2585 = vpow2.f32 %v2119_v46 }
 0xf58   :  { %v2584_v45 = vpop.eup %2583 }
 0xf59   :  { %878 = vrot.lane.b32.xlu0 %v2584_v45, %s2728_s22 }
 0xf5a   :  { %v2586_v47 = vpop.eup %2585 }
 0xf5b   :  { %v872_v48 = vadd.f32 1.0, %v2586_v47 }
 0xf5d   :  { %2587 = vrcp.f32 %v872_v48 }
 0xf67   :  { %v2588_v49 = vpop.eup %2587 }
 0xf68   :  { %v876_v55 = vmul.f32 %v2588_v49, %v2961_v51 }
 0xfcb   :  { %v879_v52 = vpop.permute.xlu0 %878 }
 0xfcc   :  { %v881_v54 = vmul.f32 %v2588_v49, %v879_v52 }
 0xfce   :  { %883 = vrot.lane.b32.xlu1 %v881_v54, %s2733_s2 }
0x1040   :  { %v884_v56 = vpop.permute.xlu1 %883 }
0x1041   :  { %v3009_v59 = vadd.f32 %v884_v56, %v876_v55 }
0x1043   :  { %2589 = vtanh.f32 %v3009_v59 }
0x104d   :  { %v2590_v41 = vpop.eup %2589 }
0x104e   :  { %889 = vrot.lane.b32.xlu0 %v2590_v41, %s2728_s22 }
0x10c0   :  { %v890_v60 = vpop.permute.xlu0 %889 }
0x10c1   :  { %v892_v61 = vmul.f32 %v2588_v49, %v890_v60 }
0x10c3   :  { %v893_v62 = vpack.c.bf16 %v892_v61, %v892_v61 }
0x10c5   :  { %895 = vrot.lane.b32.xlu1 %v893_v62, %s2733_s2 }
0x1137   :  { %v896_v63 = vpop.permute.xlu1 %895 }
0x1138   :  { %2358 = vmatmul.mubr.msk.bf16.vlgmr.msra.gmra.mrb[24].mxu1 %vm129_vm5, %v896_v63  ;;  %2366 = vmatmul.mubr.msk.bf16.vlgmr.msra.gmra.mrb[28].mxu0 %vm129_vm5, %v896_v63 }
0x1139   :  { %2370 = vmatpush3.bf16.msra.mxu1 %v2792_v10  ;;  %2373 = vmatprep.mubr.msk.bf16.mxu1 %vm2732_vm0, %v2731_v1 }
0x113a   :  { %2371 = vmatprep.subr.bf16.mxu1 %v2731_v1  ;;  %2378 = vmatpush3.bf16.msra.mxu0 %v2857_v57 }
0x113b   :  { %2379 = vmatprep.subr.bf16.mxu0 %v2731_v1  ;;  %2381 = vmatprep.mubr.msk.bf16.mxu0 %vm2732_vm0, %v2731_v1 }
0x113d   :  { %2372 = vmatpush3.bf16.msra.mxu1 %v2797_v11 }
0x113e   :  { %2380 = vmatpush3.bf16.msra.mxu0 %v2860_v58  ;;  %2385 = vmatprep.subr.bf16.mxu1 %v2731_v1 }
0x113f   :  { %2393 = vmatprep.subr.bf16.mxu0 %v2731_v1 }
0x1140   :  { %2374 = vmatmul.mubr.msk.bf16.vlgmr.msra.gmra.mrb[28].mxu1 %vm129_vm5, %v824_v31 }
0x1141   :  { %2386 = vmatpush3.bf16.msra.mxu1 %v2904_v42  ;;  %2389 = vmatprep.mubr.msk.bf16.mxu1 %vm2732_vm0, %v2731_v1 }
0x1142   :  { %2387 = vmatprep.subr.bf16.mxu1 %v2731_v1 }
0x1145   :  { %2388 = vmatpush3.bf16.msra.mxu1 %v2907_v43 }
0x1146   :  { %2401 = vmatprep.subr.bf16.mxu1 %v2731_v1 }
0x120b   :  { %v934_v51 = vpop.f32.mrb[24].mxu1  ;;  %v975_v0 = vpop.f32.mrb[28].mxu0 }
0x120c   :  { %v935_v2 = vadd.f32 %v934_v51, %v2937_v50  ;;  %v2359_v32 = vpop.f32.mrb[25].mxu1  ;;  %v2367_v3 = vpop.f32.mrb[29].mxu0 }
0x120d   :  { %v937_v34 = vpop.f32.mrb[26].mxu1  ;;  %v978_v4 = vpop.f32.mrb[30].mxu0 }
0x120e   :  { %940 = vst [vmem:[#allocation5 + $0x10] sm:$0xff] %v935_v2  ;;  %v2360_v5 = vpop.f32.mrb[27].mxu1  ;;  %v2368_v8 = vpop.f32.mrb[31].mxu0 }
0x120f   :  { %v193_v8 = vadd.f32 %v2887_v15, %v2830_v35 }
0x1213   :  { %v1015_v12 = vpop.f32.mrb[28].mxu1 }
0x1214   :  { %v1021_v14 = vadd.f32 %v1015_v12, %v188_v9  ;;  %v2375_v18 = vpop.f32.mrb[29].mxu1 }
0x1215   :  { %v1018_v40 = vpop.f32.mrb[30].mxu1 }
0x1216   :  { %2591 = vtanh.f32 %v1021_v14  ;;  %v2376_v20 = vpop.f32.mrb[31].mxu1  ;;  %v2123_v23 = vmul.f32 -1.442695, %v1021_v14 }
0x1218   :  { %2593 = vpow2.f32 %v2123_v23 }
0x1220   :  { %v2592_v22 = vpop.eup %2591 }
0x1221   :  { %1031 = vrot.lane.b32.xlu0 %v2592_v22, %s2728_s22 }
0x1222   :  { %v2594_v25 = vpop.eup %2593 }
0x1223   :  { %v1025_v36 = vadd.f32 1.0, %v2594_v25 }
0x1225   :  { %2595 = vrcp.f32 %v1025_v36 }
0x122f   :  { %v2596_v26 = vpop.eup %2595 }
0x1230   :  { %v1029_v39 = vmul.f32 %v2596_v26, %v2993_v27 }
0x1293   :  { %v1032_v53 = vpop.permute.xlu0 %1031 }
0x1294   :  { %v1034_v28 = vmul.f32 %v2596_v26, %v1032_v53 }
0x1296   :  { %1036 = vrot.lane.b32.xlu1 %v1034_v28, %s2733_s2 }
0x1308   :  { %v1037_v29 = vpop.permute.xlu1 %1036 }
0x1309   :  { %v3041_v30 = vadd.f32 %v1037_v29, %v1029_v39 }
0x130b   :  { %2597 = vtanh.f32 %v3041_v30 }
0x1315   :  { %v2598_v31 = vpop.eup %2597 }
0x1316   :  { %1042 = vrot.lane.b32.xlu0 %v2598_v31, %s2728_s22 }
0x1388   :  { %v1043_v21 = vpop.permute.xlu0 %1042 }
0x1389   :  { %v1045_v33 = vmul.f32 %v2596_v26, %v1043_v21 }
0x138b   :  { %v1046_v37 = vpack.c.bf16 %v1045_v33, %v1045_v33 }
0x138d   :  { %1048 = vrot.lane.b32.xlu1 %v1046_v37, %s2733_s2 }
0x13ff   :  { %v1049_v24 = vpop.permute.xlu1 %1048 }
0x1400   :  { %2382 = vmatmul.mubr.msk.bf16.vlgmr.msra.gmra.mrb[32].mxu0 %vm129_vm5, %v1049_v24 }
0x1401   :  { %2394 = vmatpush3.bf16.msra.mxu0 %v2784_v6  ;;  %2397 = vmatprep.mubr.msk.bf16.mxu0 %vm2732_vm0, %v2731_v1 }
0x1402   :  { %2395 = vmatprep.subr.bf16.mxu0 %v2731_v1 }
0x1405   :  { %2396 = vmatpush3.bf16.msra.mxu0 %v2788_v7 }
0x1406   :  { %2409 = vmatprep.subr.bf16.mxu0 %v2731_v1 }
0x14d3   :  { %v1087_v27 = vpop.f32.mrb[32].mxu0 }
0x14d4   :  { %v1088_v38 = vadd.f32 %v1087_v27, %v975_v0  ;;  %v2383_v44 = vpop.f32.mrb[33].mxu0 }
0x14d5   :  { %v1090_v45 = vpop.f32.mrb[34].mxu0 }
0x14d6   :  { %v1093_v46 = vadd.f32 %v1088_v38, %v2895_v19  ;;  %v2384_v47 = vpop.f32.mrb[35].mxu0 }
0x14d8   :  { %2599 = vtanh.f32 %v1093_v46  ;;  %v2125_v6 = vmul.f32 -1.442695, %v1093_v46 }
0x14da   :  { %2601 = vpow2.f32 %v2125_v6 }
0x14e2   :  { %v2600_v48 = vpop.eup %2599 }
0x14e3   :  { %1103 = vrot.lane.b32.xlu0 %v2600_v48, %s2728_s22 }
0x14e4   :  { %v2602_v49 = vpop.eup %2601 }
0x14e5   :  { %v1097_v52 = vadd.f32 1.0, %v2602_v49 }
0x14e7   :  { %2603 = vrcp.f32 %v1097_v52 }
0x14f1   :  { %v2604_v54 = vpop.eup %2603 }
0x14f2   :  { %v1101_v56 = vmul.f32 %v2604_v54, %v3009_v59 }
0x1555   :  { %v1104_v7 = vpop.permute.xlu0 %1103 }
0x1556   :  { %v1106_v55 = vmul.f32 %v2604_v54, %v1104_v7 }
0x1558   :  { %1108 = vrot.lane.b32.xlu1 %v1106_v55, %s2733_s2 }
0x15ca   :  { %v1109_v41 = vpop.permute.xlu1 %1108 }
0x15cb   :  { %v3057_v60 = vadd.f32 %v1109_v41, %v1101_v56 }
0x15cd   :  { %2605 = vtanh.f32 %v3057_v60 }
0x15d7   :  { %v2606_v61 = vpop.eup %2605 }
0x15d8   :  { %1114 = vrot.lane.b32.xlu0 %v2606_v61, %s2728_s22 }
0x164a   :  { %v1115_v62 = vpop.permute.xlu0 %1114 }
0x164b   :  { %v1117_v63 = vmul.f32 %v2604_v54, %v1115_v62 }
0x164d   :  { %v1118_v51 = vpack.c.bf16 %v1117_v63, %v1117_v63 }
0x164f   :  { %1120 = vrot.lane.b32.xlu1 %v1118_v51, %s2733_s2 }
0x16c1   :  { %v1121_v0 = vpop.permute.xlu1 %1120 }
0x16c2   :  { %2390 = vmatmul.mubr.msk.bf16.vlgmr.msra.gmra.mrb[32].mxu1 %vm129_vm5, %v1121_v0  ;;  %2398 = vmatmul.mubr.msk.bf16.vlgmr.msra.gmra.mrb[36].mxu0 %vm129_vm5, %v1121_v0 }
0x16c3   :  { %2402 = vmatpush3.bf16.msra.mxu1 %v2792_v10  ;;  %2405 = vmatprep.mubr.msk.bf16.mxu1 %vm2732_vm0, %v2731_v1 }
0x16c4   :  { %2403 = vmatprep.subr.bf16.mxu1 %v2731_v1  ;;  %2410 = vmatpush3.bf16.msra.mxu0 %v2857_v57 }
0x16c5   :  { %2411 = vmatprep.subr.bf16.mxu0 %v2731_v1  ;;  %2413 = vmatprep.mubr.msk.bf16.mxu0 %vm2732_vm0, %v2731_v1 }
0x16c7   :  { %2404 = vmatpush3.bf16.msra.mxu1 %v2797_v11 }
0x16c8   :  { %2412 = vmatpush3.bf16.msra.mxu0 %v2860_v58  ;;  %2417 = vmatprep.subr.bf16.mxu1 %v2731_v1 }
0x16c9   :  { %2425 = vmatprep.subr.bf16.mxu0 %v2731_v1 }
0x16ca   :  { %2406 = vmatmul.mubr.msk.bf16.vlgmr.msra.gmra.mrb[36].mxu1 %vm129_vm5, %v1049_v24  ;;  %v3095_v24 = vld [vmem:[#allocation2 + $0x30] sm:$0xff]  }
0x16cb   :  { %2418 = vmatpush3.bf16.msra.mxu1 %v2904_v42  ;;  %2421 = vmatprep.mubr.msk.bf16.mxu1 %vm2732_vm0, %v2731_v1 }
0x16cc   :  { %2419 = vmatprep.subr.bf16.mxu1 %v2731_v1 }
0x16cf   :  { %2420 = vmatpush3.bf16.msra.mxu1 %v2907_v43 }
0x16d0   :  { %2433 = vmatprep.subr.bf16.mxu1 %v2731_v1 }
0x1795   :  { %v1159_v10 = vpop.f32.mrb[32].mxu1  ;;  %v1200_v11 = vpop.f32.mrb[36].mxu0 }
0x1796   :  { %v1160_v59 = vadd.f32 %v1159_v10, %v2937_v50  ;;  %v2391_v2 = vpop.f32.mrb[33].mxu1  ;;  %v2399_v32 = vpop.f32.mrb[37].mxu0 }
0x1797   :  { %v1162_v3 = vpop.f32.mrb[34].mxu1  ;;  %v1203_v34 = vpop.f32.mrb[38].mxu0 }
0x1798   :  { %1165 = vst [vmem:[#allocation5 + $0x18] sm:$0xff] %v1160_v59  ;;  %v2392_v4 = vpop.f32.mrb[35].mxu1  ;;  %v2400_v5 = vpop.f32.mrb[39].mxu0 }
0x179d   :  { %v1240_v9 = vpop.f32.mrb[36].mxu1 }
0x179e   :  { %v1246_v12 = vadd.f32 %v1240_v9, %v193_v8  ;;  %v2407_v14 = vpop.f32.mrb[37].mxu1  ;;  %v196_v8 = vadd.f32 %v2891_v17, %v2830_v35 }
0x179f   :  { %v1243_v18 = vpop.f32.mrb[38].mxu1 }
0x17a0   :  { %2607 = vtanh.f32 %v1246_v12  ;;  %v2408_v40 = vpop.f32.mrb[39].mxu1  ;;  %v2129_v22 = vmul.f32 -1.442695, %v1246_v12 }
0x17a2   :  { %2609 = vpow2.f32 %v2129_v22 }
0x17aa   :  { %v2608_v20 = vpop.eup %2607 }
0x17ab   :  { %1256 = vrot.lane.b32.xlu0 %v2608_v20, %s2728_s22 }
0x17ac   :  { %v2610_v23 = vpop.eup %2609 }
0x17ad   :  { %v1250_v25 = vadd.f32 1.0, %v2610_v23 }
0x17af   :  { %2611 = vrcp.f32 %v1250_v25 }
0x17b9   :  { %v2612_v36 = vpop.eup %2611 }
0x17ba   :  { %v1254_v15 = vmul.f32 %v2612_v36, %v3041_v30  ;;  %v3101_v30 = vld [vmem:[#allocation2 + $0x38] sm:$0xff]  }
0x181d   :  { %v1257_v26 = vpop.permute.xlu0 %1256 }
0x181e   :  { %v1259_v53 = vmul.f32 %v2612_v36, %v1257_v26 }
0x1820   :  { %1261 = vrot.lane.b32.xlu1 %v1259_v53, %s2733_s2 }
0x1892   :  { %v1262_v28 = vpop.permute.xlu1 %1261 }
0x1893   :  { %v3089_v39 = vadd.f32 %v1262_v28, %v1254_v15 }
0x1895   :  { %2613 = vtanh.f32 %v3089_v39 }
0x189f   :  { %v2614_v29 = vpop.eup %2613 }
0x18a0   :  { %1267 = vrot.lane.b32.xlu0 %v2614_v29, %s2728_s22 }
0x1912   :  { %v1268_v31 = vpop.permute.xlu0 %1267 }
0x1913   :  { %v1270_v21 = vmul.f32 %v2612_v36, %v1268_v31 }
0x1915   :  { %v1271_v33 = vpack.c.bf16 %v1270_v21, %v1270_v21 }
0x1917   :  { %1273 = vrot.lane.b32.xlu1 %v1271_v33, %s2733_s2 }
0x1989   :  { %v1274_v37 = vpop.permute.xlu1 %1273 }
0x198a   :  { %2414 = vmatmul.mubr.msk.bf16.vlgmr.msra.gmra.mrb[40].mxu0 %vm129_vm5, %v1274_v37 }
0x198b   :  { %2426 = vmatpush3.bf16.msra.mxu0 %v3095_v24  ;;  %2429 = vmatprep.mubr.msk.bf16.mxu0 %vm2732_vm0, %v2731_v1 }
0x198c   :  { %2427 = vmatprep.subr.bf16.mxu0 %v2731_v1 }
0x198f   :  { %2428 = vmatpush3.bf16.msra.mxu0 %v3101_v30 }
0x1990   :  { %2441 = vmatprep.subr.bf16.mxu0 %v2731_v1 }
0x1a5d   :  { %v1312_v27 = vpop.f32.mrb[40].mxu0 }
0x1a5e   :  { %v1313_v38 = vadd.f32 %v1312_v27, %v1200_v11  ;;  %v2415_v44 = vpop.f32.mrb[41].mxu0  ;;  %v3116_v11 = vld [vmem:[#allocation2 + $0x10] sm:$0xff]  }
0x1a5f   :  { %v1315_v45 = vpop.f32.mrb[42].mxu0 }
0x1a60   :  { %v1318_v46 = vadd.f32 %v1313_v38, %v2895_v19  ;;  %v2416_v47 = vpop.f32.mrb[43].mxu0 }
0x1a62   :  { %2615 = vtanh.f32 %v1318_v46  ;;  %v2131_v6 = vmul.f32 -1.442695, %v1318_v46 }
0x1a64   :  { %2617 = vpow2.f32 %v2131_v6 }
0x1a6c   :  { %v2616_v48 = vpop.eup %2615 }
0x1a6d   :  { %1328 = vrot.lane.b32.xlu0 %v2616_v48, %s2728_s22 }
0x1a6e   :  { %v2618_v49 = vpop.eup %2617 }
0x1a6f   :  { %v1322_v52 = vadd.f32 1.0, %v2618_v49 }
0x1a71   :  { %2619 = vrcp.f32 %v1322_v52 }
0x1a7b   :  { %v2620_v54 = vpop.eup %2619 }
0x1a7c   :  { %v1326_v56 = vmul.f32 %v2620_v54, %v3057_v60  ;;  %v3126_v60 = vld [vmem:[#allocation2 + $0x18] sm:$0xff]  }
0x1adf   :  { %v1329_v7 = vpop.permute.xlu0 %1328 }
0x1ae0   :  { %v1331_v55 = vmul.f32 %v2620_v54, %v1329_v7 }
0x1ae2   :  { %1333 = vrot.lane.b32.xlu1 %v1331_v55, %s2733_s2 }
0x1b54   :  { %v1334_v41 = vpop.permute.xlu1 %1333 }
0x1b55   :  { %v3109_v61 = vadd.f32 %v1334_v41, %v1326_v56 }
0x1b57   :  { %2621 = vtanh.f32 %v3109_v61 }
0x1b61   :  { %v2622_v62 = vpop.eup %2621 }
0x1b62   :  { %1339 = vrot.lane.b32.xlu0 %v2622_v62, %s2728_s22 }
0x1bd4   :  { %v1340_v63 = vpop.permute.xlu0 %1339 }
0x1bd5   :  { %v1342_v51 = vmul.f32 %v2620_v54, %v1340_v63 }
0x1bd7   :  { %v1343_v0 = vpack.c.bf16 %v1342_v51, %v1342_v51 }
0x1bd9   :  { %1345 = vrot.lane.b32.xlu1 %v1343_v0, %s2733_s2 }
0x1c4b   :  { %v1346_v10 = vpop.permute.xlu1 %1345 }
0x1c4c   :  { %2422 = vmatmul.mubr.msk.bf16.vlgmr.msra.gmra.mrb[40].mxu1 %vm129_vm5, %v1346_v10  ;;  %2430 = vmatmul.mubr.msk.bf16.vlgmr.msra.gmra.mrb[44].mxu0 %vm129_vm5, %v1346_v10 }
0x1c4d   :  { %2434 = vmatpush3.bf16.msra.mxu1 %v3116_v11  ;;  %2437 = vmatprep.mubr.msk.bf16.mxu1 %vm2732_vm0, %v2731_v1 }
0x1c4e   :  { %2435 = vmatprep.subr.bf16.mxu1 %v2731_v1  ;;  %2442 = vmatpush3.bf16.msra.mxu0 %v2857_v57 }
0x1c4f   :  { %2443 = vmatprep.subr.bf16.mxu0 %v2731_v1  ;;  %2445 = vmatprep.mubr.msk.bf16.mxu0 %vm2732_vm0, %v2731_v1 }
0x1c51   :  { %2436 = vmatpush3.bf16.msra.mxu1 %v3126_v60 }
0x1c52   :  { %2444 = vmatpush3.bf16.msra.mxu0 %v2860_v58  ;;  %2449 = vmatprep.subr.bf16.mxu1 %v2731_v1 }
0x1c53   :  { %2457 = vmatprep.subr.bf16.mxu0 %v2731_v1 }
0x1c54   :  { %2438 = vmatmul.mubr.msk.bf16.vlgmr.msra.gmra.mrb[44].mxu1 %vm129_vm5, %v1274_v37 }
0x1c55   :  { %2450 = vmatpush3.bf16.msra.mxu1 %v2904_v42  ;;  %2453 = vmatprep.mubr.msk.bf16.mxu1 %vm2732_vm0, %v2731_v1 }
0x1c56   :  { %2451 = vmatprep.subr.bf16.mxu1 %v2731_v1 }
0x1c59   :  { %2452 = vmatpush3.bf16.msra.mxu1 %v2907_v43 }
0x1c5a   :  { %2465 = vmatprep.subr.bf16.mxu1 %v2731_v1 }
0x1d1f   :  { %v1384_v57 = vpop.f32.mrb[40].mxu1  ;;  %v1425_v59 = vpop.f32.mrb[44].mxu0 }
0x1d20   :  { %v1385_v58 = vadd.f32 %v1384_v57, %v2937_v50  ;;  %v2423_v2 = vpop.f32.mrb[41].mxu1  ;;  %v2431_v32 = vpop.f32.mrb[45].mxu0  ;;  %v3179_v57 = vld [vmem:[#allocation2 + $0x28] sm:$0xff]  }
0x1d21   :  { %v1387_v3 = vpop.f32.mrb[42].mxu1  ;;  %v1428_v34 = vpop.f32.mrb[46].mxu0 }
0x1d22   :  { %1390 = vst [vmem:[#allocation5 + $0x20] sm:$0xff] %v1385_v58  ;;  %v2424_v4 = vpop.f32.mrb[43].mxu1  ;;  %v2432_v5 = vpop.f32.mrb[47].mxu0 }
0x1d27   :  { %v1465_v9 = vpop.f32.mrb[44].mxu1 }
0x1d28   :  { %v1471_v12 = vadd.f32 %v1465_v9, %v196_v8  ;;  %v2439_v14 = vpop.f32.mrb[45].mxu1  ;;  %v201_v8 = vadd.f32 %v2885_v13, %v2830_v35 }
0x1d29   :  { %v1468_v18 = vpop.f32.mrb[46].mxu1 }
0x1d2a   :  { %2623 = vtanh.f32 %v1471_v12  ;;  %v2440_v40 = vpop.f32.mrb[47].mxu1  ;;  %v2135_v22 = vmul.f32 -1.442695, %v1471_v12 }
0x1d2c   :  { %2625 = vpow2.f32 %v2135_v22 }
0x1d34   :  { %v2624_v20 = vpop.eup %2623 }
0x1d35   :  { %1481 = vrot.lane.b32.xlu0 %v2624_v20, %s2728_s22 }
0x1d36   :  { %v2626_v23 = vpop.eup %2625 }
0x1d37   :  { %v1475_v25 = vadd.f32 1.0, %v2626_v23 }
0x1d39   :  { %2627 = vrcp.f32 %v1475_v25 }
0x1d43   :  { %v2628_v36 = vpop.eup %2627 }
0x1d44   :  { %v1479_v17 = vmul.f32 %v2628_v36, %v3089_v39 }
0x1da7   :  { %v1482_v26 = vpop.permute.xlu0 %1481 }
0x1da8   :  { %v1484_v53 = vmul.f32 %v2628_v36, %v1482_v26 }
0x1daa   :  { %1486 = vrot.lane.b32.xlu1 %v1484_v53, %s2733_s2 }
0x1e1c   :  { %v1487_v15 = vpop.permute.xlu1 %1486 }
0x1e1d   :  { %v3145_v28 = vadd.f32 %v1487_v15, %v1479_v17 }
0x1e1f   :  { %2629 = vtanh.f32 %v3145_v28 }
0x1e29   :  { %v2630_v29 = vpop.eup %2629 }
0x1e2a   :  { %1492 = vrot.lane.b32.xlu0 %v2630_v29, %s2728_s22 }
0x1e9c   :  { %v1493_v31 = vpop.permute.xlu0 %1492 }
0x1e9d   :  { %v1495_v21 = vmul.f32 %v2628_v36, %v1493_v31 }
0x1e9f   :  { %v1496_v33 = vpack.c.bf16 %v1495_v21, %v1495_v21 }
0x1ea1   :  { %1498 = vrot.lane.b32.xlu1 %v1496_v33, %s2733_s2 }
0x1f13   :  { %v1499_v37 = vpop.permute.xlu1 %1498 }
0x1f14   :  { %2446 = vmatmul.mubr.msk.bf16.vlgmr.msra.gmra.mrb[48].mxu0 %vm129_vm5, %v1499_v37 }
0x1f15   :  { %2458 = vmatpush3.bf16.msra.mxu0 %v3095_v24  ;;  %2461 = vmatprep.mubr.msk.bf16.mxu0 %vm2732_vm0, %v2731_v1 }
0x1f16   :  { %2459 = vmatprep.subr.bf16.mxu0 %v2731_v1 }
0x1f19   :  { %2460 = vmatpush3.bf16.msra.mxu0 %v3101_v30 }
0x1f1a   :  { %2473 = vmatprep.subr.bf16.mxu0 %v2731_v1 }
0x1fe7   :  { %v1537_v39 = vpop.f32.mrb[48].mxu0 }
0x1fe8   :  { %v1538_v27 = vadd.f32 %v1537_v39, %v1425_v59  ;;  %v2447_v38 = vpop.f32.mrb[49].mxu0 }
0x1fe9   :  { %v1540_v44 = vpop.f32.mrb[50].mxu0 }
0x1fea   :  { %v1543_v45 = vadd.f32 %v1538_v27, %v2895_v19  ;;  %v2448_v46 = vpop.f32.mrb[51].mxu0 }
0x1fec   :  { %2631 = vtanh.f32 %v1543_v45  ;;  %v2137_v48 = vmul.f32 -1.442695, %v1543_v45 }
0x1fee   :  { %2633 = vpow2.f32 %v2137_v48 }
0x1ff6   :  { %v2632_v47 = vpop.eup %2631 }
0x1ff7   :  { %1553 = vrot.lane.b32.xlu0 %v2632_v47, %s2728_s22 }
0x1ff8   :  { %v2634_v6 = vpop.eup %2633 }
0x1ff9   :  { %v1547_v49 = vadd.f32 1.0, %v2634_v6 }
0x1ffb   :  { %2635 = vrcp.f32 %v1547_v49 }
0x2005   :  { %v2636_v52 = vpop.eup %2635 }
0x2006   :  { %v1551_v55 = vmul.f32 %v2636_v52, %v3109_v61  ;;  %v3172_v61 = vld [vmem:[#allocation2 + $0x20] sm:$0xff]  }
0x2069   :  { %v1554_v54 = vpop.permute.xlu0 %1553 }
0x206a   :  { %v1556_v7 = vmul.f32 %v2636_v52, %v1554_v54 }
0x206c   :  { %1558 = vrot.lane.b32.xlu1 %v1556_v7, %s2733_s2 }
0x20de   :  { %v1559_v56 = vpop.permute.xlu1 %1558 }
0x20df   :  { %v3161_v41 = vadd.f32 %v1559_v56, %v1551_v55 }
0x20e1   :  { %2637 = vtanh.f32 %v3161_v41 }
0x20eb   :  { %v2638_v62 = vpop.eup %2637 }
0x20ec   :  { %1564 = vrot.lane.b32.xlu0 %v2638_v62, %s2728_s22 }
0x215e   :  { %v1565_v63 = vpop.permute.xlu0 %1564 }
0x215f   :  { %v1567_v51 = vmul.f32 %v2636_v52, %v1565_v63 }
0x2161   :  { %v1568_v0 = vpack.c.bf16 %v1567_v51, %v1567_v51 }
0x2163   :  { %1570 = vrot.lane.b32.xlu1 %v1568_v0, %s2733_s2 }
0x21d5   :  { %v1571_v10 = vpop.permute.xlu1 %1570 }
0x21d6   :  { %2454 = vmatmul.mubr.msk.bf16.vlgmr.msra.gmra.mrb[48].mxu1 %vm129_vm5, %v1571_v10  ;;  %2462 = vmatmul.mubr.msk.bf16.vlgmr.msra.gmra.mrb[52].mxu0 %vm129_vm5, %v1571_v10 }
0x21d7   :  { %2466 = vmatpush3.bf16.msra.mxu1 %v3116_v11  ;;  %2469 = vmatprep.mubr.msk.bf16.mxu1 %vm2732_vm0, %v2731_v1 }
0x21d8   :  { %2467 = vmatprep.subr.bf16.mxu1 %v2731_v1  ;;  %2474 = vmatpush3.bf16.msra.mxu0 %v3172_v61 }
0x21d9   :  { %2475 = vmatprep.subr.bf16.mxu0 %v2731_v1  ;;  %2477 = vmatprep.mubr.msk.bf16.mxu0 %vm2732_vm0, %v2731_v1 }
0x21db   :  { %2468 = vmatpush3.bf16.msra.mxu1 %v3126_v60 }
0x21dc   :  { %2476 = vmatpush3.bf16.msra.mxu0 %v3179_v57  ;;  %2481 = vmatprep.subr.bf16.mxu1 %v2731_v1 }
0x21dd   :  { %2489 = vmatprep.subr.bf16.mxu0 %v2731_v1 }
0x21de   :  { %2470 = vmatmul.mubr.msk.bf16.vlgmr.msra.gmra.mrb[52].mxu1 %vm129_vm5, %v1499_v37 }
0x21df   :  { %2482 = vmatpush3.bf16.msra.mxu1 %v2904_v42  ;;  %2485 = vmatprep.mubr.msk.bf16.mxu1 %vm2732_vm0, %v2731_v1 }
0x21e0   :  { %2483 = vmatprep.subr.bf16.mxu1 %v2731_v1 }
0x21e3   :  { %2484 = vmatpush3.bf16.msra.mxu1 %v2907_v43 }
0x21e4   :  { %2497 = vmatprep.subr.bf16.mxu1 %v2731_v1 }
0x22a9   :  { %v1609_v59 = vpop.f32.mrb[48].mxu1  ;;  %v1650_v58 = vpop.f32.mrb[52].mxu0 }
0x22aa   :  { %v1610_v2 = vadd.f32 %v1609_v59, %v2937_v50  ;;  %v2455_v32 = vpop.f32.mrb[49].mxu1  ;;  %v2463_v3 = vpop.f32.mrb[53].mxu0 }
0x22ab   :  { %v1612_v34 = vpop.f32.mrb[50].mxu1  ;;  %v1653_v4 = vpop.f32.mrb[54].mxu0  ;;  %v204_v32 = vadd.f32 %v2889_v16, %v2830_v35 }
0x22ac   :  { %1615 = vst [vmem:[#allocation5 + $0x28] sm:$0xff] %v1610_v2  ;;  %v2456_v5 = vpop.f32.mrb[51].mxu1  ;;  %v2464_v42 = vpop.f32.mrb[55].mxu0 }
0x22b1   :  { %v1690_v9 = vpop.f32.mrb[52].mxu1 }
0x22b2   :  { %v1696_v12 = vadd.f32 %v1690_v9, %v201_v8  ;;  %v2471_v14 = vpop.f32.mrb[53].mxu1 }
0x22b3   :  { %v1693_v43 = vpop.f32.mrb[54].mxu1 }
0x22b4   :  { %2639 = vtanh.f32 %v1696_v12  ;;  %v2472_v18 = vpop.f32.mrb[55].mxu1  ;;  %v2141_v20 = vmul.f32 -1.442695, %v1696_v12 }
0x22b6   :  { %2641 = vpow2.f32 %v2141_v20 }
0x22be   :  { %v2640_v40 = vpop.eup %2639 }
0x22bf   :  { %1706 = vrot.lane.b32.xlu0 %v2640_v40, %s2728_s22 }
0x22c0   :  { %v2642_v22 = vpop.eup %2641 }
0x22c1   :  { %v1700_v23 = vadd.f32 1.0, %v2642_v22 }
0x22c3   :  { %2643 = vrcp.f32 %v1700_v23 }
0x22cd   :  { %v2644_v25 = vpop.eup %2643 }
0x22ce   :  { %v1704_v13 = vmul.f32 %v2644_v25, %v3145_v28 }
0x2331   :  { %v1707_v36 = vpop.permute.xlu0 %1706 }
0x2332   :  { %v1709_v26 = vmul.f32 %v2644_v25, %v1707_v36 }
0x2334   :  { %1711 = vrot.lane.b32.xlu1 %v1709_v26, %s2733_s2 }
0x23a6   :  { %v1712_v53 = vpop.permute.xlu1 %1711 }
0x23a7   :  { %v3197_v17 = vadd.f32 %v1712_v53, %v1704_v13 }
0x23a9   :  { %2645 = vtanh.f32 %v3197_v17 }
0x23b3   :  { %v2646_v15 = vpop.eup %2645 }
0x23b4   :  { %1717 = vrot.lane.b32.xlu0 %v2646_v15, %s2728_s22 }
0x2426   :  { %v1718_v29 = vpop.permute.xlu0 %1717 }
0x2427   :  { %v1720_v31 = vmul.f32 %v2644_v25, %v1718_v29 }
0x2429   :  { %v1721_v21 = vpack.c.bf16 %v1720_v31, %v1720_v31 }
0x242b   :  { %1723 = vrot.lane.b32.xlu1 %v1721_v21, %s2733_s2 }
0x249d   :  { %v1724_v33 = vpop.permute.xlu1 %1723 }
0x249e   :  { %2478 = vmatmul.mubr.msk.bf16.vlgmr.msra.gmra.mrb[56].mxu0 %vm129_vm5, %v1724_v33 }
0x249f   :  { %2490 = vmatpush3.bf16.msra.mxu0 %v3095_v24  ;;  %2493 = vmatprep.mubr.msk.bf16.mxu0 %vm2732_vm0, %v2731_v1 }
0x24a0   :  { %2491 = vmatprep.subr.bf16.mxu0 %v2731_v1 }
0x24a3   :  { %2492 = vmatpush3.bf16.msra.mxu0 %v3101_v30 }
0x24a4   :  { %2505 = vmatprep.subr.bf16.mxu0 %v2731_v1 }
0x2571   :  { %v1762_v28 = vpop.f32.mrb[56].mxu0 }
0x2572   :  { %v1763_v37 = vadd.f32 %v1762_v28, %v1650_v58  ;;  %v2479_v39 = vpop.f32.mrb[57].mxu0 }
0x2573   :  { %v1765_v27 = vpop.f32.mrb[58].mxu0 }
0x2574   :  { %v1768_v38 = vadd.f32 %v1763_v37, %v2895_v19  ;;  %v2480_v44 = vpop.f32.mrb[59].mxu0 }
0x2576   :  { %2647 = vtanh.f32 %v1768_v38  ;;  %v2143_v24 = vmul.f32 -1.442695, %v1768_v38 }
0x2578   :  { %2649 = vpow2.f32 %v2143_v24 }
0x2580   :  { %v2648_v45 = vpop.eup %2647 }
0x2581   :  { %1778 = vrot.lane.b32.xlu0 %v2648_v45, %s2728_s22 }
0x2582   :  { %v2650_v46 = vpop.eup %2649 }
0x2583   :  { %v1772_v47 = vadd.f32 1.0, %v2650_v46 }
0x2585   :  { %2651 = vrcp.f32 %v1772_v47 }
0x258f   :  { %v2652_v48 = vpop.eup %2651 }
0x2590   :  { %v1776_v49 = vmul.f32 %v2652_v48, %v3161_v41  ;;  %v2678_v41 = vld [vmem:[#allocation2 + $0x48] sm:$0xff]  }
0x25f3   :  { %v1779_v30 = vpop.permute.xlu0 %1778 }
0x25f4   :  { %v1781_v6 = vmul.f32 %v2652_v48, %v1779_v30 }
0x25f6   :  { %1783 = vrot.lane.b32.xlu1 %v1781_v6, %s2733_s2 }
0x2668   :  { %v1784_v52 = vpop.permute.xlu1 %1783 }
0x2669   :  { %v3213_v54 = vadd.f32 %v1784_v52, %v1776_v49 }
0x266b   :  { %2653 = vtanh.f32 %v3213_v54 }
0x2675   :  { %v2654_v7 = vpop.eup %2653 }
0x2676   :  { %1789 = vrot.lane.b32.xlu0 %v2654_v7, %s2728_s22 }
0x26e8   :  { %v1790_v55 = vpop.permute.xlu0 %1789 }
0x26e9   :  { %v1792_v56 = vmul.f32 %v2652_v48, %v1790_v55 }
0x26eb   :  { %v1793_v62 = vpack.c.bf16 %v1792_v56, %v1792_v56 }
0x26ed   :  { %1795 = vrot.lane.b32.xlu1 %v1793_v62, %s2733_s2 }
0x275f   :  { %v1796_v63 = vpop.permute.xlu1 %1795 }
0x2760   :  { %2486 = vmatmul.mubr.msk.bf16.vlgmr.msra.gmra.mrb[56].mxu1 %vm129_vm5, %v1796_v63  ;;  %2494 = vmatmul.mubr.msk.bf16.vlgmr.msra.gmra.mrb[60].mxu0 %vm129_vm5, %v1796_v63 }
0x2761   :  { %2498 = vmatpush3.bf16.msra.mxu1 %v3116_v11  ;;  %2501 = vmatprep.mubr.msk.bf16.mxu1 %vm2732_vm0, %v2731_v1  ;;  %v2677_v11 = vld [vmem:[#allocation2 + $0x40] sm:$0xff]  }
0x2762   :  { %2499 = vmatprep.subr.bf16.mxu1 %v2731_v1  ;;  %2506 = vmatpush3.bf16.msra.mxu0 %v3172_v61 }
0x2763   :  { %2507 = vmatprep.subr.bf16.mxu0 %v2731_v1  ;;  %2509 = vmatprep.mubr.msk.bf16.mxu0 %vm2732_vm0, %v2731_v1 }
0x2765   :  { %2500 = vmatpush3.bf16.msra.mxu1 %v3126_v60 }
0x2766   :  { %2508 = vmatpush3.bf16.msra.mxu0 %v3179_v57  ;;  %2513 = vmatprep.subr.bf16.mxu1 %v2731_v1 }
0x2768   :  { %2502 = vmatmul.mubr.msk.bf16.vlgmr.msra.gmra.mrb[60].mxu1 %vm129_vm5, %v1724_v33 }
0x2769   :  { %2514 = vmatpush3.bf16.msra.mxu1 %v2677_v11  ;;  %2517 = vmatprep.mubr.msk.bf16.mxu1 %vm2732_vm0, %v2731_v1 }
0x276a   :  { %2515 = vmatprep.subr.bf16.mxu1 %v2731_v1 }
0x276d   :  { %2516 = vmatpush3.bf16.msra.mxu1 %v2678_v41 }
0x2833   :  { %v1834_v51 = vpop.f32.mrb[56].mxu1  ;;  %v1875_v0 = vpop.f32.mrb[60].mxu0 }
0x2834   :  { %v1835_v10 = vadd.f32 %v1834_v51, %v2937_v50  ;;  %v2487_v60 = vpop.f32.mrb[57].mxu1  ;;  %v2495_v61 = vpop.f32.mrb[61].mxu0 }
0x2835   :  { %v1837_v57 = vpop.f32.mrb[58].mxu1  ;;  %v1878_v59 = vpop.f32.mrb[62].mxu0 }
0x2836   :  { %1840 = vst [vmem:[#allocation5 + $0x30] sm:$0xff] %v1835_v10  ;;  %v2488_v58 = vpop.f32.mrb[59].mxu1  ;;  %v2496_v2 = vpop.f32.mrb[63].mxu0 }
0x283b   :  { %v1915_v3 = vpop.f32.mrb[60].mxu1 }
0x283c   :  { %v1921_v34 = vadd.f32 %v1915_v3, %v204_v32  ;;  %v2503_v4 = vpop.f32.mrb[61].mxu1 }
0x283d   :  { %v1918_v1 = vpop.f32.mrb[62].mxu1 }
0x283e   :  { %2655 = vtanh.f32 %v1921_v34  ;;  %v2504_v5 = vpop.f32.mrb[63].mxu1  ;;  %v2147_v8 = vmul.f32 -1.442695, %v1921_v34 }
0x2840   :  { %2657 = vpow2.f32 %v2147_v8 }
0x2848   :  { %v2656_v42 = vpop.eup %2655 }
0x2849   :  { %1931 = vrot.lane.b32.xlu0 %v2656_v42, %s2728_s22 }
0x284a   :  { %v2658_v9 = vpop.eup %2657 }
0x284b   :  { %v1925_v12 = vadd.f32 1.0, %v2658_v9 }
0x284d   :  { %2659 = vrcp.f32 %v1925_v12 }
0x2857   :  { %v2660_v14 = vpop.eup %2659 }
0x2858   :  { %v1929_v35 = vmul.f32 %v2660_v14, %v3197_v17 }
0x28bb   :  { %v1932_v43 = vpop.permute.xlu0 %1931 }
0x28bc   :  { %v1934_v18 = vmul.f32 %v2660_v14, %v1932_v43 }
0x28be   :  { %1936 = vrot.lane.b32.xlu1 %v1934_v18, %s2733_s2 }
0x2930   :  { %v1937_v16 = vpop.permute.xlu1 %1936 }
0x2931   :  { %v1939_v40 = vadd.f32 %v1937_v16, %v1929_v35 }
0x2933   :  { %2661 = vtanh.f32 %v1939_v40 }
0x293d   :  { %v2662_v20 = vpop.eup %2661 }
0x293e   :  { %1942 = vrot.lane.b32.xlu0 %v2662_v20, %s2728_s22 }
0x29b0   :  { %v1943_v22 = vpop.permute.xlu0 %1942 }
0x29b1   :  { %v1945_v23 = vmul.f32 %v2660_v14, %v1943_v22 }
0x29b3   :  { %v1946_v25 = vpack.c.bf16 %v1945_v23, %v1945_v23 }
0x29b5   :  { %1948 = vrot.lane.b32.xlu1 %v1946_v25, %s2733_s2 }
0x2a27   :  { %v1949_v36 = vpop.permute.xlu1 %1948 }
0x2a28   :  { %2510 = vmatmul.mubr.msk.bf16.vlgmr.msra.gmra.mrb[64].mxu0 %vm129_vm5, %v1949_v36 }
0x2afb   :  { %v1987_v26 = vpop.f32.mrb[64].mxu0 }
0x2afc   :  { %v1988_v13 = vadd.f32 %v1987_v26, %v1875_v0  ;;  %v2511_v53 = vpop.f32.mrb[65].mxu0 }
0x2afd   :  { %v1990_v15 = vpop.f32.mrb[66].mxu0 }
0x2afe   :  { %v1993_v17 = vadd.f32 %v1988_v13, %v2895_v19  ;;  %v2512_v29 = vpop.f32.mrb[67].mxu0 }
0x2b00   :  { %2663 = vtanh.f32 %v1993_v17  ;;  %v2149_v21 = vmul.f32 -1.442695, %v1993_v17 }
0x2b02   :  { %2665 = vpow2.f32 %v2149_v21 }
0x2b0a   :  { %v2664_v31 = vpop.eup %2663 }
0x2b0b   :  { %2003 = vrot.lane.b32.xlu0 %v2664_v31, %s2728_s22 }
0x2b0c   :  { %v2666_v33 = vpop.eup %2665 }
0x2b0d   :  { %v1997_v28 = vadd.f32 1.0, %v2666_v33 }
0x2b0f   :  { %2667 = vrcp.f32 %v1997_v28 }
0x2b19   :  { %v2668_v37 = vpop.eup %2667 }
0x2b1a   :  { %v2001_v38 = vmul.f32 %v2668_v37, %v3213_v54 }
0x2b7d   :  { %v2004_v39 = vpop.permute.xlu0 %2003 }
0x2b7e   :  { %v2006_v27 = vmul.f32 %v2668_v37, %v2004_v39 }
0x2b80   :  { %2008 = vrot.lane.b32.xlu1 %v2006_v27, %s2733_s2 }
0x2bf2   :  { %v2009_v44 = vpop.permute.xlu1 %2008 }
0x2bf3   :  { %v2011_v45 = vadd.f32 %v2009_v44, %v2001_v38 }
0x2bf5   :  { %2669 = vtanh.f32 %v2011_v45 }
0x2bff   :  { %v2670_v19 = vpop.eup %2669 }
0x2c00   :  { %2014 = vrot.lane.b32.xlu0 %v2670_v19, %s2728_s22 }
0x2c72   :  { %v2015_v24 = vpop.permute.xlu0 %2014 }
0x2c73   :  { %v2017_v46 = vmul.f32 %v2668_v37, %v2015_v24 }
0x2c75   :  { %v2018_v47 = vpack.c.bf16 %v2017_v46, %v2017_v46 }
0x2c77   :  { %2020 = vrot.lane.b32.xlu1 %v2018_v47, %s2733_s2 }
0x2ce9   :  { %v2021_v48 = vpop.permute.xlu1 %2020 }
0x2cea   :  { %2518 = vmatmul.mubr.msk.bf16.vlgmr.msra.gmra.mrb[64].mxu1 %vm129_vm5, %v2021_v48 }
0x2dbd   :  { %v2059_v30 = vpop.f32.mrb[64].mxu1 }
0x2dbe   :  { %v2060_v6 = vadd.f32 %v2059_v30, %v2937_v50  ;;  %v2519_v49 = vpop.f32.mrb[65].mxu1 }
0x2dbf   :  { %v2062_v52 = vpop.f32.mrb[66].mxu1 }
0x2dc0   :  { %2065 = vst [vmem:[#allocation5 + $0x38] sm:$0xff] %v2060_v6  ;;  %v2520_v54 = vpop.f32.mrb[67].mxu1 }
0x2dc1   :  { %2712 = shalt.err (!%p2709_p12)
}
0x2dc2   :  { %s2713_s20 = scalar_lea.hbm %s3267_s3, 1024 }
0x2dc3   :  { %p2714_p13 = scmp.ne.s32.totalorder %s3267_s3, %s2713_s20  ;;  %p2717_p0 = scmp.lt.u32.totalorder %s2713_s20, %s3267_s3 }
0x2dc5   :  { %p2719_p1 = pnand %p2717_p0, %p2714_p13 }
0x2dc7   :  { %2722 = shalt.err (!%p2719_p1)
}
0x2dc8   :  { %s2735_s25 = smov 128   ;;  %s2736_s26 = smov 8  }
0x2dc9   :  { %2077 = dma.vmem_to_hbm [thread:$0]  %s2072_s16, 1024, %s3267_s3, [#allocation4], %s2735_s25, %s2735_s25, %s2736_s26  }
0x2dca   :  { %2725 = dma.done.wait [#allocation4], 1024  }
0x2dcb   :  { %2726 = vsyncadd [#allocation4], 4294966272 }
0x2dcc   :  { %2081 = vsyncpa [#allocation3], 1 }
0x2dcd   :  { %2082 = vsyncpa [#allocation4], 1 }

</bundles_post_ra>
